<compile_context>
chip_gen: v5e
topology: v5e:2x2
jax: 0.10.0
libtpu: 0.0.40
codegen_flags: <defaults>
</compile_context>

<pallas_src>
import functools

import jax
import jax.numpy as jnp
import numpy as np
from jax.experimental import pallas as pl
from jax.experimental.pallas import tpu as pltpu


# ----------------------------- configuration ---------------------------------
N_LAGS = 7                 # odd, as asserted in the PyTorch module
PADDING = N_LAGS // 2
SPS = 2                    # samples_per_symbol
N_UNLU = 3                 # n_hidden_unlus
UNLU_DEPTH = 2             # number of hidden Linear(M,M) blocks per UNLU
UNLU_HIDDEN = 32           # M
HID = N_UNLU * UNLU_HIDDEN # fused hidden width (96)
SEQ_LEN = 128              # length of one input signal
NOUT_PAD = 128             # per-signal output lanes (n_out=64 padded to lane-dense 128)
LAGP = ((N_LAGS + 1 + 7) // 8) * 8   # lag rows + ones (bias) row, sublane-padded -> 8
BATCH = 8                  # number of signals
B_TILE = 4                 # signals per grid step (packed along lanes)


# ------------------------------- kernel --------------------------------------
def wh_fused_kernel(xlag_ref, w1_ref, wh_ref, b_ref, wfin_ref, c2t_ref, y_ref, *, depth):
    """Fused Wiener-Hammerstein forward; hidden on sublanes, (batch*seq) on lanes.

    Shapes (T = B_tile*N, T_out = B_tile*128):
      xlag_ref : (LAGP, T)  f32   im2col of padded inputs; row N_LAGS is all-ones (bias)
      w1_ref   : (H, LAGP)  f32   fused (w_in ⊗ k1 | b_in): FIR#1 + input proj + bias
      wh_ref   : (D, H, H)  bf16  block-diagonal fused hidden weights (transposed)
      b_ref    : (H, D+1)   f32   cols 0..D-1 hidden biases, col D = folded b_final
      wfin_ref : (1, H)     f32   fused w_out * w_j
      c2t_ref  : (T, T_out) f32   strided FIR#2 as a batch-block-diagonal tap matrix
      y_ref    : (1, T_out) f32
    """
    f32, bf16 = jnp.float32, jnp.bfloat16

    # FIR #1 + input projection + input bias (via the ones row), then ReLU.   (H, T)
    h = jnp.dot(w1_ref[...], xlag_ref[...], preferred_element_type=f32)
    h = jnp.maximum(h, 0.0)

    # Fused block-diagonal hidden layers: bf16 MXU operands, f32 accumulate,
    # bias + ReLU in f32 on the VPU (Dropout = identity in eval mode).
    for d in range(depth):
        h = jnp.dot(wh_ref[d], h.astype(bf16), preferred_element_type=f32)
        h = jnp.maximum(h + b_ref[:, d:d + 1], 0.0)

    # Tail reordered by associativity: project first -> (1, T), then strided FIR#2
    # as a single matmul with the (batch-block-diagonal) tap matrix -> (1, T_out).
    r = jnp.dot(wfin_ref[...], h, preferred_element_type=f32)          # (1, T)
    r = r + b_ref[0:1, depth:depth + 1]                                 # + b_final
    y_ref[...] = jnp.dot(r, c2t_ref[...], preferred_element_type=f32)  # (1, T_out)


# --------------------------- parameter fusion ---------------------------------
def prepare_operands(params, batch_tile, seq_len=SEQ_LEN):
    """One-time fusion of PyTorch-shaped parameters into kernel operands.

    Called once per parameter set (hoisted out of the per-call jit path).
    """
    M, U, D, H = UNLU_HIDDEN, N_UNLU, UNLU_DEPTH, HID
    f32 = jnp.float32
    k1 = params["k1"][:, 0].astype(f32)                                    # (n_lags,)
    k2 = params["k2"][:, 0].astype(f32)                                    # (n_lags,)

    w_in = jnp.concatenate([params["w_in"][u, 0, :] for u in range(U)])    # (H,)
    b_in = jnp.concatenate([params["b_in"][u] for u in range(U)])          # (H,)

    # FIR#1 + input projection + input bias fused into one (H, LAGP) matrix:
    #   cols 0..n_lags-1: w_in ⊗ k1 ; col n_lags: b_in (multiplies the ones row).
    w1 = jnp.zeros((H, LAGP), f32)
    w1 = w1.at[:, :N_LAGS].set(w_in[:, None] * k1[None, :])
    w1 = w1.at[:, N_LAGS].set(b_in)

    # Block-diagonal fused hidden weights (transposed) -> bf16 MXU operands.
    wh_layers, bh_cols = [], []
    for layer in range(D):
        blocks = [params["w_h"][u * D + layer].T for u in range(U)]        # (M, M) each
        wh_layers.append(jax.scipy.linalg.block_diag(*blocks))
        bh_cols.append(jnp.concatenate([params["b_h"][u * D + layer] for u in range(U)]))
    wh = jnp.stack(wh_layers).astype(jnp.bfloat16)                         # (D, H, H)

    # out-projection and linear join fused into one (1, H) row + folded scalar bias.
    wfin = jnp.concatenate([params["w_out"][u, :, 0] * params["w_j"][u, 0]
                            for u in range(U)])[None, :].astype(f32)       # (1, H)
    b_final = jnp.sum(params["b_out"][:, 0] * params["w_j"][:, 0]) + params["b_j"][0, 0]

    # All remaining biases packed into a single (H, D+1) operand.
    b_all = jnp.stack(bh_cols + [jnp.full((H,), b_final, f32)], axis=1)    # (H, D+1)

    # Strided FIR#2 as a lane-dense tap matrix (n_out padded to 128 columns),
    # made block-diagonal over the batch tile so the tail is one (1,T)x(T,T_out) matmul.
    n = seq_len
    n_out = (n + 2 * PADDING - N_LAGS) // SPS + 1
    i_idx = jnp.arange(n)[:, None]
    j_idx = jnp.arange(NOUT_PAD)[None, :]
    tap = i_idx - SPS * j_idx + PADDING
    valid = (tap >= 0) & (tap < N_LAGS) & (j_idx < n_out)
    c2t = jnp.where(valid, k2[jnp.clip(tap, 0, N_LAGS - 1)], 0.0).astype(f32)  # (N, 128)
    c2t_big = jnp.kron(jnp.eye(batch_tile, dtype=f32), c2t)                # (bt*N, bt*128)

    return {"w1": w1, "wh": wh, "b_all": b_all, "wfin": wfin, "c2t": c2t_big}


# ------------------------------- wrapper --------------------------------------
def wiener_hammerstein_forward(xb, ops):
    """xb: (B, N) f32 batch of signals -> y: (B, n_out) f32."""
    B, n = xb.shape
    b_tile = ops["c2t"].shape[0] // n           # static (from operand shape)
    assert B % b_tile == 0, (B, b_tile)
    n_out = (n + 2 * PADDING - N_LAGS) // SPS + 1

    # Per-input prep: per-signal zero padding + im2col, packed (LAGP, B*N) with
    # column index = b*N + i; row N_LAGS is all-ones (carries the input bias).
    # TODO(synk): this could move into the kernel via pltpu.roll on a padded lane row.
    xb = xb.astype(jnp.float32)
    xpad = jnp.pad(xb, ((0, 0), (PADDING, PADDING)))
    lag = jnp.stack([xpad[:, k:k + n] for k in range(N_LAGS)], axis=0)      # (7, B, N)
    ones = jnp.ones((1, B, n), jnp.float32)
    fill = jnp.zeros((LAGP - N_LAGS - 1, B, n), jnp.float32)
    xlag = jnp.concatenate([lag, ones, fill], axis=0).reshape(LAGP, B * n)  # (8, B*N)

    grid = (B // b_tile,)
    T = b_tile * n
    T_out = b_tile * NOUT_PAD

    kernel = functools.partial(wh_fused_kernel, depth=UNLU_DEPTH)
    y = pl.pallas_call(
        kernel,
        out_shape=jax.ShapeDtypeStruct((1, B * NOUT_PAD), jnp.float32),
        grid_spec=pltpu.PrefetchScalarGridSpec(
            num_scalar_prefetch=0,
            grid=grid,
            in_specs=[
                # streamed per batch tile:
                pl.BlockSpec((LAGP, T), lambda g: (0, g)),
                # weights/biases: constant index maps -> fetched once, VMEM-resident
                pl.BlockSpec((HID, LAGP), lambda g: (0, 0)),
                pl.BlockSpec((UNLU_DEPTH, HID, HID), lambda g: (0, 0, 0)),
                pl.BlockSpec((HID, UNLU_DEPTH + 1), lambda g: (0, 0)),
                pl.BlockSpec((1, HID), lambda g: (0, 0)),
                pl.BlockSpec((T, T_out), lambda g: (0, 0)),
            ],
            out_specs=pl.BlockSpec((1, T_out), lambda g: (0, g)),
        ),
        compiler_params=pltpu.CompilerParams(
            dimension_semantics=("parallel",)),     # shard batch tiles across TCs (v7x)
    )(xlag, ops["w1"], ops["wh"], ops["b_all"], ops["wfin"], ops["c2t"])

    return y.reshape(B, NOUT_PAD)[:, :n_out]


# --------------------------- parameter construction --------------------------
def init_params(key):
    """Deterministic synthetic parameters matching the PyTorch module's shapes."""
    M = UNLU_HIDDEN

    def linear(key, fan_in, shape_w, shape_b):
        kw, kb = jax.random.split(key)
        bound = 1.0 / np.sqrt(fan_in)
        w = jax.random.uniform(kw, shape_w, jnp.float32, -bound, bound)
        b = jax.random.uniform(kb, shape_b, jnp.float32, -bound, bound)
        return w, b

    # FIR kernels: delta at the center, as in the module's __init__
    k_init = np.zeros((N_LAGS, 1), np.float32)
    k_init[N_LAGS // 2, 0] = 1.0

    keys = jax.random.split(key, 2 + N_UNLU * (2 + UNLU_DEPTH))
    ki = iter(keys)

    w_in, b_in, w_h, b_h, w_out, b_out = [], [], [], [], [], []
    for _ in range(N_UNLU):
        w, b = linear(next(ki), 1, (1, M), (M,))
        w_in.append(w); b_in.append(b)
        for _ in range(UNLU_DEPTH):
            w, b = linear(next(ki), M, (M, M), (M,))
            w_h.append(w); b_h.append(b)
        w, b = linear(next(ki), M, (M, 1), (1,))
        w_out.append(w); b_out.append(b)

    wj, bj = linear(next(ki), N_UNLU, (N_UNLU, 1), (1,))

    return {
        "k1": jnp.asarray(k_init),
        "k2": jnp.asarray(k_init),
        "w_in": jnp.stack(w_in),                 # (U, 1, M)
        "b_in": jnp.stack(b_in),                 # (U, M)
        "w_h": jnp.stack(w_h),                   # (U*depth, M, M)
        "b_h": jnp.stack(b_h),                   # (U*depth, M)
        "w_out": jnp.stack(w_out),               # (U, M, 1)
        "b_out": jnp.stack(b_out),               # (U, 1)
        "w_j": wj,                               # (U, 1)
        "b_j": bj[None, :],                      # (1, 1)
    }


# ------------------------------ pure-JAX reference ----------------------------
def reference_forward(x, params):
    """Direct (unfused, f32) mirror of the PyTorch forward, for correctness checking."""
    pad = PADDING
    xpad = jnp.concatenate([jnp.zeros((pad,)), x, jnp.zeros((pad,))])
    k1 = params["k1"][:, 0]
    k2 = params["k2"][:, 0]
    n = x.shape[0]

    z = sum(k1[k] * xpad[k:k + n] for k in range(N_LAGS))           # (N,)
    zc = z[:, None]                                                 # (N, 1)

    feats = []
    for u in range(N_UNLU):
        h = jnp.maximum(zc @ params["w_in"][u] + params["b_in"][u][None, :], 0.0)
        for d in range(UNLU_DEPTH):
            idx = u * UNLU_DEPTH + d
            h = jnp.maximum(h @ params["w_h"][idx] + params["b_h"][idx][None, :], 0.0)
        feats.append(h @ params["w_out"][u] + params["b_out"][u][None, :])
    u_mat = jnp.concatenate(feats, axis=1)
    z2 = (u_mat @ params["w_j"] + params["b_j"])[:, 0]              # (N,)

    z2pad = jnp.concatenate([jnp.zeros((pad,)), z2, jnp.zeros((pad,))])
    n_out = (z2pad.shape[0] - N_LAGS) // SPS + 1
    y = jnp.stack([sum(k2[k] * z2pad[j * SPS + k] for k in range(N_LAGS))
                   for j in range(n_out)])
    return y


# ---------------------------------- main --------------------------------------
if __name__ == "__main__":
    key = jax.random.PRNGKey(0)
    k_x, k_p = jax.random.split(key)

    xb = jax.random.normal(k_x, (BATCH, SEQ_LEN), jnp.float32)
    params = init_params(k_p)

    # Parameter fusion runs once per parameter set (hoisted out of the call path).
    ops = prepare_operands(params, B_TILE)

    fwd = jax.jit(wiener_hammerstein_forward)
    y = jax.block_until_ready(fwd(xb, ops))

    y_ref = jax.vmap(lambda xx: reference_forward(xx, params))(xb)
    assert y.shape == y_ref.shape, (y.shape, y_ref.shape)
    # Tolerance accounts for bf16 MXU operands in the hidden layers (f32 accumulate);
    # algebra bugs would show errors orders of magnitude larger.
    np.testing.assert_allclose(np.asarray(y), np.asarray(y_ref), rtol=2e-2, atol=2e-2)

    print("KERNEL_OK")
</pallas_src>

<mosaic_0001>
module attributes {stable_mosaic.version = 11 : i64} {
  func.func @wh_fused_kernel(%arg0: i32, %arg1: memref<8x512xf32, #tpu.memory_space<vmem>>, %arg2: memref<96x8xf32, #tpu.memory_space<vmem>>, %arg3: memref<2x96x96xbf16, #tpu.memory_space<vmem>>, %arg4: memref<96x3xf32, #tpu.memory_space<vmem>>, %arg5: memref<1x96xf32, #tpu.memory_space<vmem>>, %arg6: memref<512x512xf32, #tpu.memory_space<vmem>>, %arg7: memref<1x512xf32, #tpu.memory_space<vmem>>) attributes {dimension_semantics = [#tpu.dimension_semantics<parallel>], iteration_bounds = array<i64: 2>, scalar_prefetch = 0 : i64, scratch_operands = 0 : i64, tpu.core_type = #tpu.core_type<tc>, window_params = [{transform_indices = @transform_0, window_bounds = array<i64: 8, 512>}, {pipeline_mode = #tpu.pipeline_mode<synchronous>, transform_indices = @transform_1, window_bounds = array<i64: 96, 8>}, {pipeline_mode = #tpu.pipeline_mode<synchronous>, transform_indices = @transform_2, window_bounds = array<i64: 2, 96, 96>}, {pipeline_mode = #tpu.pipeline_mode<synchronous>, transform_indices = @transform_3, window_bounds = array<i64: 96, 3>}, {pipeline_mode = #tpu.pipeline_mode<synchronous>, transform_indices = @transform_4, window_bounds = array<i64: 1, 96>}, {pipeline_mode = #tpu.pipeline_mode<synchronous>, transform_indices = @transform_5, window_bounds = array<i64: 512, 512>}, {transform_indices = @transform_6, window_bounds = array<i64: 1, 512>}]} {
    %c0 = arith.constant 0 : index
    %c0_0 = arith.constant 0 : index
    %0 = vector.load %arg2[%c0, %c0_0] : memref<96x8xf32, #tpu.memory_space<vmem>>, vector<96x8xf32>
    %c0_1 = arith.constant 0 : index
    %c0_2 = arith.constant 0 : index
    %1 = vector.load %arg1[%c0_1, %c0_2] : memref<8x512xf32, #tpu.memory_space<vmem>>, vector<8x512xf32>
    %cst = arith.constant dense<0.000000e+00> : vector<96x512xf32>
    %2 = tpu.matmul %0, %1, %cst {dimension_numbers = #tpu.dot_dimension_numbers<[1], [0], [0], [1], [0, 0, 1, 1], [], []>} : vector<96x8xf32>, vector<8x512xf32>, vector<96x512xf32> -> vector<96x512xf32>
    %cst_3 = arith.constant 0.000000e+00 : f32
    %3 = vector.broadcast %cst_3 : f32 to vector<96x512xf32>
    %4 = arith.maximumf %2, %3 : vector<96x512xf32>
    %c0_4 = arith.constant 0 : index
    %c0_5 = arith.constant 0 : index
    %c0_6 = arith.constant 0 : index
    %5 = vector.load %arg3[%c0_4, %c0_5, %c0_6] : memref<2x96x96xbf16, #tpu.memory_space<vmem>>, vector<1x96x96xbf16>
    %6 = vector.shape_cast %5 : vector<1x96x96xbf16> to vector<96x96xbf16>
    %7 = arith.truncf %4 : vector<96x512xf32> to vector<96x512xbf16>
    %cst_7 = arith.constant dense<0.000000e+00> : vector<96x512xf32>
    %8 = tpu.matmul %6, %7, %cst_7 {dimension_numbers = #tpu.dot_dimension_numbers<[1], [0], [0], [1], [0, 0, 1, 1], [], []>} : vector<96x96xbf16>, vector<96x512xbf16>, vector<96x512xf32> -> vector<96x512xf32>
    %c0_8 = arith.constant 0 : index
    %c0_9 = arith.constant 0 : index
    %9 = vector.load %arg4[%c0_8, %c0_9] : memref<96x3xf32, #tpu.memory_space<vmem>>, vector<96x1xf32>
    %10 = vector.broadcast %9 : vector<96x1xf32> to vector<96x512xf32>
    %11 = arith.addf %8, %10 : vector<96x512xf32>
    %cst_10 = arith.constant 0.000000e+00 : f32
    %12 = vector.broadcast %cst_10 : f32 to vector<96x512xf32>
    %13 = arith.maximumf %11, %12 : vector<96x512xf32>
    %c1 = arith.constant 1 : index
    %c0_11 = arith.constant 0 : index
    %c0_12 = arith.constant 0 : index
    %14 = vector.load %arg3[%c1, %c0_11, %c0_12] : memref<2x96x96xbf16, #tpu.memory_space<vmem>>, vector<1x96x96xbf16>
    %15 = vector.shape_cast %14 : vector<1x96x96xbf16> to vector<96x96xbf16>
    %16 = arith.truncf %13 : vector<96x512xf32> to vector<96x512xbf16>
    %cst_13 = arith.constant dense<0.000000e+00> : vector<96x512xf32>
    %17 = tpu.matmul %15, %16, %cst_13 {dimension_numbers = #tpu.dot_dimension_numbers<[1], [0], [0], [1], [0, 0, 1, 1], [], []>} : vector<96x96xbf16>, vector<96x512xbf16>, vector<96x512xf32> -> vector<96x512xf32>
    %c0_14 = arith.constant 0 : index
    %c1_15 = arith.constant 1 : index
    %18 = vector.load %arg4[%c0_14, %c1_15] : memref<96x3xf32, #tpu.memory_space<vmem>>, vector<96x1xf32>
    %19 = vector.broadcast %18 : vector<96x1xf32> to vector<96x512xf32>
    %20 = arith.addf %17, %19 : vector<96x512xf32>
    %cst_16 = arith.constant 0.000000e+00 : f32
    %21 = vector.broadcast %cst_16 : f32 to vector<96x512xf32>
    %22 = arith.maximumf %20, %21 : vector<96x512xf32>
    %c0_17 = arith.constant 0 : index
    %c0_18 = arith.constant 0 : index
    %23 = vector.load %arg5[%c0_17, %c0_18] : memref<1x96xf32, #tpu.memory_space<vmem>>, vector<1x96xf32>
    %cst_19 = arith.constant dense<0.000000e+00> : vector<1x512xf32>
    %24 = tpu.matmul %23, %22, %cst_19 {dimension_numbers = #tpu.dot_dimension_numbers<[1], [0], [0], [1], [0, 0, 1, 1], [], []>} : vector<1x96xf32>, vector<96x512xf32>, vector<1x512xf32> -> vector<1x512xf32>
    %c0_20 = arith.constant 0 : index
    %c2 = arith.constant 2 : index
    %25 = vector.load %arg4[%c0_20, %c2] : memref<96x3xf32, #tpu.memory_space<vmem>>, vector<1x1xf32>
    %26 = vector.broadcast %25 : vector<1x1xf32> to vector<1x512xf32>
    %27 = arith.addf %24, %26 : vector<1x512xf32>
    %c0_21 = arith.constant 0 : index
    %c0_22 = arith.constant 0 : index
    %28 = vector.load %arg6[%c0_21, %c0_22] : memref<512x512xf32, #tpu.memory_space<vmem>>, vector<512x512xf32>
    %cst_23 = arith.constant dense<0.000000e+00> : vector<1x512xf32>
    %29 = tpu.matmul %27, %28, %cst_23 {dimension_numbers = #tpu.dot_dimension_numbers<[1], [0], [0], [1], [0, 0, 1, 1], [], []>} : vector<1x512xf32>, vector<512x512xf32>, vector<1x512xf32> -> vector<1x512xf32>
    %c0_24 = arith.constant 0 : index
    %c0_25 = arith.constant 0 : index
    %30 = vector.load %arg7[%c0_24, %c0_25] : memref<1x512xf32, #tpu.memory_space<vmem>>, vector<1x512xf32>
    tpu.vector_store %arg7[%c0_24, %c0_25], %29 {strides = array<i32>} : memref<1x512xf32, #tpu.memory_space<vmem>>, vector<1x512xf32>,
    return
  }
  func.func @transform_0(%arg0: i32) -> (i32, i32) {
    %c0_i32 = arith.constant 0 : i32
    %c0_i32_0 = arith.constant 0 : i32
    return %c0_i32, %arg0 : i32, i32
  }
  func.func @transform_1(%arg0: i32) -> (i32, i32) {
    %c0_i32 = arith.constant 0 : i32
    %c0_i32_0 = arith.constant 0 : i32
    %c0_i32_1 = arith.constant 0 : i32
    return %c0_i32, %c0_i32_0 : i32, i32
  }
  func.func @transform_2(%arg0: i32) -> (i32, i32, i32) {
    %c0_i32 = arith.constant 0 : i32
    %c0_i32_0 = arith.constant 0 : i32
    %c0_i32_1 = arith.constant 0 : i32
    %c0_i32_2 = arith.constant 0 : i32
    return %c0_i32, %c0_i32_0, %c0_i32_1 : i32, i32, i32
  }
  func.func @transform_3(%arg0: i32) -> (i32, i32) {
    %c0_i32 = arith.constant 0 : i32
    %c0_i32_0 = arith.constant 0 : i32
    %c0_i32_1 = arith.constant 0 : i32
    return %c0_i32, %c0_i32_0 : i32, i32
  }
  func.func @transform_4(%arg0: i32) -> (i32, i32) {
    %c0_i32 = arith.constant 0 : i32
    %c0_i32_0 = arith.constant 0 : i32
    %c0_i32_1 = arith.constant 0 : i32
    return %c0_i32, %c0_i32_0 : i32, i32
  }
  func.func @transform_5(%arg0: i32) -> (i32, i32) {
    %c0_i32 = arith.constant 0 : i32
    %c0_i32_0 = arith.constant 0 : i32
    %c0_i32_1 = arith.constant 0 : i32
    return %c0_i32, %c0_i32_0 : i32, i32
  }
  func.func @transform_6(%arg0: i32) -> (i32, i32) {
    %c0_i32 = arith.constant 0 : i32
    %c0_i32_0 = arith.constant 0 : i32
    return %c0_i32, %arg0 : i32, i32
  }
}

</mosaic_0001>

<bundles_post_ra>
// kernel: wiener_hammerstein_forward.1
= control target key start
LH: loop header
LB: loop body
LE: loop exit
PB: predicated region body
PF: predicated region fallthrough
CT: control target
= control target key end

     0   :  { %11 = vsyncpa [#allocation3], 0  ;;  %s3285_s0 = inlined_call_operand.vmem [shape: f32[8,1024], index: 0, kind: input, shape index: {}]   ;;  %s3286_s1 = inlined_call_operand.vmem [shape: f32[96,8], index: 1, kind: input, shape index: {}]   ;;  %s3287_s2 = inlined_call_operand.vmem [shape: bf16[2,96,96], index: 2, kind: input, shape index: {}]   ;;  %s3288_s3 = inlined_call_operand.vmem [shape: f32[96,3], index: 3, kind: input, shape index: {}]   ;;  %s3289_s4 = inlined_call_operand.vmem [shape: f32[1,96], index: 4, kind: input, shape index: {}]   ;;  %s3290_s5 = inlined_call_operand.hbm [shape: f32[512,512], index: 5, kind: input, shape index: {}]   ;;  %s3291_s6 = inlined_call_operand.hbm [shape: f32[1,1024], index: 6, kind: output, shape index: {}]  }
   0x1   :  { %12 = vsyncpa [#allocation4], 0 }
   0x2   :  { %14 = vsyncpa [#allocation4 + $0x1], 0  ;;  %s2441_s21 = smov 0   ;;  %s2443_s22 = smov 0  }
   0x3   :  { %s2445_s23 = smov 0   ;;  %s2447_s24 = smov 0  }
   0x4 LB: > { %s2462_s25 = sadd.s32 4294967295, %s2398_s24   ;;  %s2054_s26 = sadd.s32 4294967294, %s2398_s24   ;;  %s2398_s24 = sphi %s2447_s24, %s3326_s24   ;;  %s2394_s23 = sphi %s2445_s23, %s3325_s23   ;;  %s2390_s22 = sphi %s2443_s22, %s3324_s22   ;;  %s2386_s21 = sphi %s2441_s21, %s3323_s21  }
   0x5   : > { %s2466_s27 = sadd.s32 1, %s2398_s24   ;;  %s158_s28 = sadd.s32 1, %s2394_s23 }
   0x6   : > { %s155_s29 = ssub.s32 %s2398_s24, %s2466_s27  ;;  %p168_p0 = scmp.ne.s32.totalorder %s2394_s23, %s2390_s22 }
   0x7   : > { %p156_p1 = scmp.eq.s32.totalorder %s155_s29, 0  ;;  %p169_p2 = scmp.eq.s32.totalorder %s2462_s25, 1 }
   0x8   : > { %p174_p3 = scmp.ne.s32.totalorder %s2390_s22, %s2386_s21  ;;  %p175_p4 = scmp.eq.s32.totalorder %s2054_s26, 1 }
   0x9   : > { %s2477_s30 = scalar_select %p156_p1, %s2394_s23, %s158_s28  }
   0xa   : > { %p2479_p5 = por %p169_p2, %p168_p0  ;;  %p2483_p6 = por %p175_p4, %p174_p3 }
   0xb   : > { %p2055_p7 = scmp.ge.s32.totalorder %s2398_s24, 1  ;;  %p182_p8 = scmp.lt.s32.totalorder %s2398_s24, 3 }
   0xc   : > { %p2253_p9 = scmp.eq.s32.totalorder %s2462_s25, 0  ;;  %s205_s11 = sshll.u32 %s3290_s5, 4  ;;  %s206_s11 = int_to_ptr.hbm [resolvable:$true] %s205_s11 }
   0xd   : > { %p183_p10 = pnand %p2055_p7, %p182_p8  ;;  %s2400_s12 = smov [#allocation2]  }
   0xe   : > { %s207_s13 = sshll.u32 %s2400_s12, 4  ;;  %s2401_s14 = smov 512   ;;  %s208_s13 = int_to_ptr.vmem [resolvable:$true] %s207_s13 }
   0xf   : > { %p2245_p11 = pneg %p183_p10  ;;  %s2402_s15 = smov 32  }
  0x10   : > { %232 = sbr.rel (%p183_p10) target bundleno = 1118 (0x45e), region = 44 }
  0x11   : > { %p2246_p12 = pnand %p2253_p9, %p2245_p11 }
  0x13   : > { %2248 = dma.hbm_to_vmem [thread:$0]  (!%p2246_p12), %s206_s11, 32768, %s208_s13, [#allocation3], %s2401_s14, %s2401_s14, %s2402_s15  }
  0x15   : > { %2377 = dma.done.wait (%p2253_p9), [#allocation3], 32768  }
  0x16   : > { %2379 = vsyncadd (%p2253_p9), [#allocation3], 4294934528  ;;  %s2500_s16 = sshll.u32 %s2462_s25, 2  ;;  %vm287_vm0 = vcmask 64512   ;;  %v271_v4 = vld [vmem:[%s3286_s1] sm:$0xff]  ;;  %v272_v5 = vld [vmem:[%s3286_s1 + $0x8] sm:$0xff] }
  0x17   : > { %p264_p13 = scmp.lt.s32.totalorder %s2500_s16, 7  ;;  %v273_v6 = vld [vmem:[%s3286_s1 + $0x10] sm:$0xff]  ;;  %v274_v7 = vld [vmem:[%s3286_s1 + $0x18] sm:$0xff]  ;;  %v275_v8 = vld [vmem:[%s3286_s1 + $0x20] sm:$0xff]  ;;  %v2403_v59 = vmov 0   ;;  %vm722_vm1 = vcmask 785408   ;;  %s1978_s11 = scalar_lea.hbm %s3291_s6, %s2500_s16 }
  0x18   : > { %v276_v9 = vld [vmem:[%s3286_s1 + $0x28] sm:$0xff]  ;;  %v277_v10 = vld [vmem:[%s3286_s1 + $0x30] sm:$0xff]  ;;  %v278_v11 = vld [vmem:[%s3286_s1 + $0x38] sm:$0xff]  ;;  %2295 = vset.pattern.permute.xlu1 %v2403_v59  ;;  %2294 = vset.pattern.permute.xlu0 %v2403_v59  ;;  %s260_s29 = sand.u32 1, %s2390_s22   ;;  %vm1955_vm2 = vcmask 1040384   ;;  %vm1957_vm3 = vcmask 1042434  }
  0x19   : > { %s265_s17 = scalar_select %p264_p13, %s2500_s16, 7  ;;  %v279_v12 = vld [vmem:[%s3286_s1 + $0x40] sm:$0xff]  ;;  %v280_v13 = vld [vmem:[%s3286_s1 + $0x48] sm:$0xff]  ;;  %v281_v14 = vld [vmem:[%s3286_s1 + $0x50] sm:$0xff]  ;;  %2296 = vset.pattern.permute.xlu2 %v2403_v59  ;;  %vm1959_vm4 = vcmask 1041408  }
  0x1a   : > { %v282_v15 = vld [vmem:[%s3286_s1 + $0x58] sm:$0xff]  ;;  %v2662_v58 = vld [vmem:[%s3288_s3 + $0x40] sm:$0xff]  ;;  %s2060_s25 = sshll.u32 %s260_s29, 2  ;;  %s1982_s14 = sshll.u32 %s1978_s11, 4  ;;  %s1983_s14 = int_to_ptr.hbm [resolvable:$true] %s1982_s14 }
  0x1b   : > { %s2062_s18 = sshll.u32 %s265_s17, 3  ;;  %674 = vperm.xlu1 %2295, %v2662_v58   ;;  %s262_s12 = scalar_lea.vmem [#allocation5], %s2060_s25 }
  0x1c   : > { %s267_s26 = scalar_lea.vmem %s3285_s0, %s2062_s18  ;;  %s1980_s13 = sshll.u32 %s262_s12, 4  ;;  %s1981_s13 = int_to_ptr.vmem [resolvable:$true] %s1980_s13 }
  0x1d   : > { %v283_v0 = vld [vmem:[%s267_s26] sm:$0xff]  ;;  %v284_v1 = vld [vmem:[%s267_s26 + $0x8] sm:$0xff]  ;;  %v285_v2 = vld [vmem:[%s267_s26 + $0x10] sm:$0xff]  ;;  %s1968_s16 = scalar_lea.sflag [#allocation4], %s260_s29  ;;  %s2346_s15 = sshra.s32 %s1983_s14, 4  ;;  %s2347_s15 = int_to_ptr.hbm [resolvable:$true] %s2346_s15 }
  0x1e   : > { %339 = vmatpush.msra.mxu0 %v283_v0  ;;  %392 = vmatpush.msra.mxu1 %v284_v1  ;;  %v286_v3 = vld [vmem:[%s267_s26 + $0x18] sm:$0xff]  ;;  %s2348_s17 = scalar_lea.hbm %s2347_s15, 4  ;;  %s2352_s20 = scalar_lea.hbm %s3291_s6, 8 }
  0x1f   : > { %445 = vmatpush.msra.mxu2 %v285_v2  ;;  %498 = vmatpush.msra.mxu3 %v286_v3  ;;  %p2349_p0 = scmp.ne.s32.totalorder %s2347_s15, %s2348_s17  ;;  %p2353_p3 = scmp.lt.s32.totalorder %s2347_s15, %s3291_s6 }
  0x20   : > { %2063 = vmatmul.msk.f32.vlgmr.msra.gmra.mxu0 %vm287_vm0, %v271_v4  ;;  %2075 = vmatmul.msk.f32.vlgmr.msra.gmra.mxu1 %vm287_vm0, %v271_v4  ;;  %p2354_p4 = scmp.lt.s32.totalorder %s2352_s20, %s2348_s17 }
  0x21   : > { %2087 = vmatmul.msk.f32.vlgmr.msra.gmra.mxu2 %vm287_vm0, %v271_v4  ;;  %2099 = vmatmul.msk.f32.vlgmr.msra.gmra.mxu3 %vm287_vm0, %v271_v4  ;;  %p2350_p1 = pnand %p2349_p0, %p2479_p5 }
  0x22   : > { %p2355_p7 = por %p2354_p4, %p2353_p3 }
  0x23   : > { %p2351_p2 = pneg %p2350_p1 }
  0x25   : > { %p2356_p8 = pnand %p2355_p7, %p2351_p2 }
  0x28   : > { %2064 = vmatmul.msk.f32.gmra.mxu0 %vm287_vm0, %v272_v5  ;;  %2076 = vmatmul.msk.f32.gmra.mxu1 %vm287_vm0, %v272_v5 }
  0x29   : > { %2088 = vmatmul.msk.f32.gmra.mxu2 %vm287_vm0, %v272_v5  ;;  %2100 = vmatmul.msk.f32.gmra.mxu3 %vm287_vm0, %v272_v5 }
  0x30   : > { %2065 = vmatmul.msk.f32.gmra.mxu0 %vm287_vm0, %v273_v6  ;;  %2077 = vmatmul.msk.f32.gmra.mxu1 %vm287_vm0, %v273_v6 }
  0x31   : > { %2089 = vmatmul.msk.f32.gmra.mxu2 %vm287_vm0, %v273_v6  ;;  %2101 = vmatmul.msk.f32.gmra.mxu3 %vm287_vm0, %v273_v6 }
  0x38   : > { %2066 = vmatmul.msk.f32.gmra.mxu0 %vm287_vm0, %v274_v7  ;;  %2078 = vmatmul.msk.f32.gmra.mxu1 %vm287_vm0, %v274_v7 }
  0x39   : > { %2090 = vmatmul.msk.f32.gmra.mxu2 %vm287_vm0, %v274_v7  ;;  %2102 = vmatmul.msk.f32.gmra.mxu3 %vm287_vm0, %v274_v7 }
  0x40   : > { %2067 = vmatmul.msk.f32.gmra.mxu0 %vm287_vm0, %v275_v8  ;;  %2079 = vmatmul.msk.f32.gmra.mxu1 %vm287_vm0, %v275_v8 }
  0x41   : > { %2091 = vmatmul.msk.f32.gmra.mxu2 %vm287_vm0, %v275_v8  ;;  %2103 = vmatmul.msk.f32.gmra.mxu3 %vm287_vm0, %v275_v8 }
  0x48   : > { %2068 = vmatmul.msk.f32.gmra.mxu0 %vm287_vm0, %v276_v9  ;;  %2080 = vmatmul.msk.f32.gmra.mxu1 %vm287_vm0, %v276_v9 }
  0x49   : > { %2092 = vmatmul.msk.f32.gmra.mxu2 %vm287_vm0, %v276_v9  ;;  %2104 = vmatmul.msk.f32.gmra.mxu3 %vm287_vm0, %v276_v9 }
  0x50   : > { %2069 = vmatmul.msk.f32.gmra.mxu0 %vm287_vm0, %v277_v10  ;;  %2081 = vmatmul.msk.f32.gmra.mxu1 %vm287_vm0, %v277_v10 }
  0x51   : > { %2093 = vmatmul.msk.f32.gmra.mxu2 %vm287_vm0, %v277_v10  ;;  %2105 = vmatmul.msk.f32.gmra.mxu3 %vm287_vm0, %v277_v10  ;;  %v2668_v10 = vld [vmem:[%s3288_s3 + $0x48] sm:$0xff] }
  0x52   : > { %679 = vperm.xlu1 %2295, %v2668_v10  }
  0x58   : > { %2070 = vmatmul.msk.f32.gmra.mxu0 %vm287_vm0, %v278_v11  ;;  %2082 = vmatmul.msk.f32.gmra.mxu1 %vm287_vm0, %v278_v11 }
  0x59   : > { %2094 = vmatmul.msk.f32.gmra.mxu2 %vm287_vm0, %v278_v11  ;;  %2106 = vmatmul.msk.f32.gmra.mxu3 %vm287_vm0, %v278_v11 }
  0x60   : > { %2071 = vmatmul.msk.f32.gmra.mxu0 %vm287_vm0, %v279_v12  ;;  %2083 = vmatmul.msk.f32.gmra.mxu1 %vm287_vm0, %v279_v12 }
  0x61   : > { %2095 = vmatmul.msk.f32.gmra.mxu2 %vm287_vm0, %v279_v12  ;;  %2107 = vmatmul.msk.f32.gmra.mxu3 %vm287_vm0, %v279_v12 }
  0x68   : > { %2072 = vmatmul.msk.f32.gmra.mxu0 %vm287_vm0, %v280_v13  ;;  %2084 = vmatmul.msk.f32.gmra.mxu1 %vm287_vm0, %v280_v13 }
  0x69   : > { %2096 = vmatmul.msk.f32.gmra.mxu2 %vm287_vm0, %v280_v13  ;;  %2108 = vmatmul.msk.f32.gmra.mxu3 %vm287_vm0, %v280_v13 }
  0x70   : > { %2073 = vmatmul.msk.f32.gmra.mxu0 %vm287_vm0, %v281_v14  ;;  %2085 = vmatmul.msk.f32.gmra.mxu1 %vm287_vm0, %v281_v14 }
  0x71   : > { %2097 = vmatmul.msk.f32.gmra.mxu2 %vm287_vm0, %v281_v14  ;;  %2109 = vmatmul.msk.f32.gmra.mxu3 %vm287_vm0, %v281_v14 }
  0x78   : > { %2074 = vmatmul.msk.f32.gmra.mxu0 %vm287_vm0, %v282_v15  ;;  %2086 = vmatmul.msk.f32.gmra.mxu1 %vm287_vm0, %v282_v15 }
  0x79   : > { %2098 = vmatmul.msk.f32.gmra.mxu2 %vm287_vm0, %v282_v15  ;;  %2110 = vmatmul.msk.f32.gmra.mxu3 %vm287_vm0, %v282_v15 }
  0x9d   : > { %v2591_v16 = vpop.f32.mrf.mxu0  ;;  %v2593_v17 = vpop.f32.mrf.mxu1 }
  0xa4   : > { %v2595_v18 = vpop.f32.mrf.mxu2  ;;  %v2597_v19 = vpop.f32.mrf.mxu3 }
  0xa5   : > { %v2599_v20 = vpop.f32.mrf.mxu0  ;;  %v2601_v21 = vpop.f32.mrf.mxu1 }
  0xac   : > { %v2603_v22 = vpop.f32.mrf.mxu2  ;;  %v2605_v23 = vpop.f32.mrf.mxu3 }
  0xad   : > { %v2607_v24 = vpop.f32.mrf.mxu0  ;;  %v2609_v25 = vpop.f32.mrf.mxu1 }
  0xb4   : > { %v2611_v26 = vpop.f32.mrf.mxu2  ;;  %v2613_v27 = vpop.f32.mrf.mxu3 }
  0xb5   : > { %v2615_v28 = vpop.f32.mrf.mxu0  ;;  %v2617_v29 = vpop.f32.mrf.mxu1 }
  0xbc   : > { %v2619_v30 = vpop.f32.mrf.mxu2  ;;  %v2621_v31 = vpop.f32.mrf.mxu3 }
  0xbd   : > { %v2623_v32 = vpop.f32.mrf.mxu0  ;;  %v2625_v33 = vpop.f32.mrf.mxu1 }
  0xc4   : > { %v2627_v34 = vpop.f32.mrf.mxu2  ;;  %v2629_v35 = vpop.f32.mrf.mxu3 }
  0xc5   : > { %v2631_v36 = vpop.f32.mrf.mxu0  ;;  %v2633_v37 = vpop.f32.mrf.mxu1 }
  0xcc   : > { %v2635_v38 = vpop.f32.mrf.mxu2  ;;  %v2637_v39 = vpop.f32.mrf.mxu3 }
  0xcd   : > { %v2639_v40 = vpop.f32.mrf.mxu0  ;;  %v2641_v41 = vpop.f32.mrf.mxu1 }
  0xce   : > { %v560_v13 = vmax.f32 %v2639_v40, 0.0  ;;  %v561_v14 = vmax.f32 %v2641_v41, 0.0 }
  0xd4   : > { %v2643_v42 = vpop.f32.mrf.mxu2  ;;  %v2645_v43 = vpop.f32.mrf.mxu3 }
  0xd5   : > { %v362_v44 = vpop.f32.mrf.mxu0  ;;  %v415_v45 = vpop.f32.mrf.mxu1 }
  0xd6   : > { %v564_v15 = vmax.f32 %v362_v44, 0.0  ;;  %v556_v44 = vmax.f32 %v2631_v36, 0.0 }
  0xdc   : > { %v2647_v46 = vpop.f32.mrf.mxu2  ;;  %v2649_v47 = vpop.f32.mrf.mxu3 }
  0xdd   : > { %v365_v48 = vpop.f32.mrf.mxu0  ;;  %v418_v49 = vpop.f32.mrf.mxu1  ;;  %v566_v36 = vmax.f32 %v2647_v46, 0.0  ;;  %v536_v46 = vmax.f32 %v2591_v16, 0.0  ;;  %v2704_v16 = vld [vmem:[%s3288_s3 + $0x50] sm:$0xff] }
  0xde   : > { %v568_v0 = vmax.f32 %v365_v48, 0.0  ;;  %v569_v1 = vmax.f32 %v418_v49, 0.0  ;;  %v565_v48 = vmax.f32 %v415_v45, 0.0  ;;  %v557_v45 = vmax.f32 %v2633_v37, 0.0  ;;  %684 = vperm.xlu0 %2294, %v2704_v16  }
  0xdf   : > { %v567_v37 = vmax.f32 %v2649_v47, 0.0  ;;  %v537_v47 = vmax.f32 %v2593_v17, 0.0  ;;  %v2709_v17 = vld [vmem:[%s3288_s3] sm:$0xff] }
  0xe0   : > { %3297 = vst [vmem:[#allocation8_spill] sm:$0xff] %v2709_v17 }
  0xe4   : > { %v2651_v50 = vpop.f32.mrf.mxu2  ;;  %v2653_v51 = vpop.f32.mrf.mxu3 }
  0xe5   : > { %v368_v52 = vpop.f32.mrf.mxu0  ;;  %v421_v53 = vpop.f32.mrf.mxu1 }
  0xe6   : > { %v572_v4 = vmax.f32 %v368_v52, 0.0  ;;  %v573_v5 = vmax.f32 %v421_v53, 0.0 }
  0xe8   : > { %v612_v11 = vpack.c.bf16 %v572_v4, %v568_v0  ;;  %v613_v12 = vpack.c.bf16 %v573_v5, %v569_v1 }
  0xec   : > { %v2655_v54 = vpop.f32.mrf.mxu2  ;;  %v2657_v55 = vpop.f32.mrf.mxu3 }
  0xed   : > { %v371_v56 = vpop.f32.mrf.mxu0  ;;  %v424_v57 = vpop.f32.mrf.mxu1  ;;  %v574_v0 = vmax.f32 %v2655_v54, 0.0  ;;  %v575_v40 = vmax.f32 %v2657_v55, 0.0  ;;  %v544_v54 = vmax.f32 %v2607_v24, 0.0  ;;  %v545_v55 = vmax.f32 %v2609_v25, 0.0 }
  0xee   : > { %v576_v60 = vmax.f32 %v371_v56, 0.0  ;;  %v577_v61 = vmax.f32 %v424_v57, 0.0  ;;  %v562_v24 = vmax.f32 %v2643_v42, 0.0  ;;  %v563_v25 = vmax.f32 %v2645_v43, 0.0 }
  0xef   : > { %v541_v42 = vmax.f32 %v2601_v21, 0.0  ;;  %v550_v21 = vmax.f32 %v2619_v30, 0.0  ;;  %v542_v30 = vmax.f32 %v2603_v22, 0.0  ;;  %v539_v22 = vmax.f32 %v2597_v19, 0.0  ;;  %v2750_v19 = vld [vmem:[%s3288_s3 + $0x20] sm:$0xff] }
  0xf4   : > { %v477_v62 = vpop.f32.mrf.mxu2  ;;  %v530_v63 = vpop.f32.mrf.mxu3 }
  0xf5   : > { %v374_v2 = vpop.f32.mrf.mxu0  ;;  %v427_v3 = vpop.f32.mrf.mxu1  ;;  %v578_v53 = vmax.f32 %v477_v62, 0.0  ;;  %v579_v56 = vmax.f32 %v530_v63, 0.0  ;;  %v608_v62 = vpack.c.bf16 %v564_v15, %v560_v13  ;;  %v609_v63 = vpack.c.bf16 %v565_v48, %v561_v14 }
  0xf6   : > { %v580_v6 = vmax.f32 %v374_v2, 0.0  ;;  %v581_v7 = vmax.f32 %v427_v3, 0.0  ;;  %v571_v2 = vmax.f32 %v2653_v51, 0.0  ;;  %v549_v51 = vmax.f32 %v2617_v29, 0.0 }
  0xf7   : > { %v611_v29 = vpack.c.bf16 %v567_v37, %v563_v25  ;;  %v546_v15 = vmax.f32 %v2611_v26, 0.0  ;;  %v547_v48 = vmax.f32 %v2613_v27, 0.0  ;;  %v2733_v26 = vld [vmem:[%s3288_s3 + $0x58] sm:$0xff]  ;;  %v538_v27 = vmax.f32 %v2595_v18, 0.0 }
  0xf8   : > { %v616_v8 = vpack.c.bf16 %v580_v6, %v576_v60  ;;  %v617_v9 = vpack.c.bf16 %v581_v7, %v577_v61  ;;  %v552_v60 = vmax.f32 %v2623_v32, 0.0  ;;  %v553_v61 = vmax.f32 %v2625_v33, 0.0  ;;  %v2682_v32 = vld [vmem:[%s3288_s3 + $0x28] sm:$0xff]  ;;  %689 = vperm.xlu0 %2294, %v2733_v26   ;;  %v2745_v18 = vld [vmem:[%s3288_s3 + $0x38] sm:$0xff] }
  0xf9   : > { %v570_v33 = vmax.f32 %v2651_v50, 0.0  ;;  %v615_v4 = vpack.c.bf16 %v575_v40, %v571_v2  ;;  %659 = vperm.xlu1 %2295, %v2682_v32   ;;  %v548_v50 = vmax.f32 %v2615_v28, 0.0  ;;  %v558_v7 = vmax.f32 %v2635_v38, 0.0  ;;  %v2230_v40 = vld [vmem:[%s3287_s2 + $0x18] sm:$0xff] }
  0xfa   : > { %743 = vmatpush.bf16.msrb.mxu0 %v616_v8  ;;  %782 = vmatpush.bf16.msrb.mxu1 %v617_v9  ;;  %v604_v5 = vpack.c.bf16 %v556_v44, %v552_v60  ;;  %v605_v6 = vpack.c.bf16 %v557_v45, %v553_v61  ;;  %v559_v28 = vmax.f32 %v2637_v39, 0.0  ;;  %v610_v8 = vpack.c.bf16 %v566_v36, %v562_v24  ;;  %v2765_v60 = vld [vmem:[%s3288_s3 + $0x18] sm:$0xff]  ;;  %v2776_v61 = vld [vmem:[%s3288_s3 + $0x8] sm:$0xff] }
  0xfb   : > { %v614_v3 = vpack.c.bf16 %v574_v0, %v570_v33  ;;  %v540_v9 = vmax.f32 %v2599_v20, 0.0  ;;  %v601_v43 = vpack.c.bf16 %v549_v51, %v545_v55  ;;  %v554_v38 = vmax.f32 %v2627_v34, 0.0  ;;  %v2716_v20 = vld [vmem:[%s3288_s3 + $0x30] sm:$0xff]  ;;  %3299 = vst [vmem:[#allocation10_spill] sm:$0xff] %v2776_v61 }
  0xfc   : > { %v480_v49 = vpop.f32.mrf.mxu2  ;;  %v533_v52 = vpop.f32.mrf.mxu3  ;;  %v555_v39 = vmax.f32 %v2629_v35, 0.0  ;;  %v597_v35 = vpack.c.bf16 %v541_v42, %v537_v47  ;;  %664 = vperm.xlu2 %2296, %v2716_v20   ;;  %v2229_v0 = vld [vmem:[%s3287_s2 + $0x10] sm:$0xff] }
  0xfd   : > { %v582_v57 = vmax.f32 %v480_v49, 0.0  ;;  %v583_v59 = vmax.f32 %v533_v52, 0.0  ;;  %v606_v13 = vpack.c.bf16 %v558_v7, %v554_v38  ;;  %v596_v34 = vpack.c.bf16 %v540_v9, %v536_v46 }
  0xfe   : > { %744 = vmatpush.bf16.msrb.mxu0 %v612_v11  ;;  %783 = vmatpush.bf16.msrb.mxu1 %v613_v12  ;;  %v600_v11 = vpack.c.bf16 %v548_v50, %v544_v54  ;;  %v551_v12 = vmax.f32 %v2621_v31, 0.0  ;;  %v607_v14 = vpack.c.bf16 %v559_v28, %v555_v39  ;;  %v2227_v31 = vld [vmem:[%s3287_s2] sm:$0xff]  ;;  %v543_v49 = vmax.f32 %v2605_v23, 0.0 }
  0xff   : > { %v618_v1 = vpack.c.bf16 %v582_v57, %v578_v53  ;;  %v619_v41 = vpack.c.bf16 %v583_v59, %v579_v56  ;;  %v602_v52 = vpack.c.bf16 %v550_v21, %v546_v15  ;;  %v598_v56 = vpack.c.bf16 %v542_v30, %v538_v27  ;;  %v2228_v57 = vld [vmem:[%s3287_s2 + $0x8] sm:$0xff]  ;;  %v2760_v59 = vld [vmem:[%s3288_s3 + $0x10] sm:$0xff]  ;;  %v2859_v21 = vpop.permute.xlu1 %674 }
 0x100   : > { %v603_v53 = vpack.c.bf16 %v551_v12, %v547_v48  ;;  %v599_v23 = vpack.c.bf16 %v543_v49, %v539_v22  ;;  %654 = vperm.xlu0 %2294, %v2750_v19   ;;  %3298 = vst [vmem:[#allocation9_spill] sm:$0xff] %v2760_v59 }
 0x101   : > { %821 = vmatpush.bf16.msrb.mxu2 %v618_v1  ;;  %860 = vmatpush.bf16.msrb.mxu3 %v619_v41  ;;  %v2231_v1 = vld [vmem:[%s3287_s2 + $0x20] sm:$0xff]  ;;  %v2232_v41 = vld [vmem:[%s3287_s2 + $0x28] sm:$0xff] }
 0x102   : > { %745 = vmatpush.bf16.msrb.mxu0 %v608_v62  ;;  %784 = vmatpush.bf16.msrb.mxu1 %v609_v63 }
 0x103   : > { %634 = vperm.xlu1 %2295, %v2709_v17  }
 0x104   : > { %669 = vperm.xlu2 %2296, %v2745_v18  }
 0x105   : > { %822 = vmatpush.bf16.msrb.mxu2 %v614_v3  ;;  %861 = vmatpush.bf16.msrb.mxu3 %v615_v4 }
 0x106   : > { %746 = vmatpush.bf16.msrb.mxu0 %v604_v5  ;;  %785 = vmatpush.bf16.msrb.mxu1 %v605_v6 }
 0x108   : > { %649 = vperm.xlu0 %2294, %v2765_v60  }
 0x109   : > { %823 = vmatpush.bf16.msrb.mxu2 %v610_v8  ;;  %862 = vmatpush.bf16.msrb.mxu3 %v611_v29 }
 0x10a   : > { %747 = vmatpush.bf16.msrb.mxu0 %v600_v11  ;;  %786 = vmatpush.bf16.msrb.mxu1 %v601_v43 }
 0x10c   : > { %644 = vperm.xlu2 %2296, %v2760_v59  }
 0x10d   : > { %824 = vmatpush.bf16.msrb.mxu2 %v606_v13  ;;  %863 = vmatpush.bf16.msrb.mxu3 %v607_v14 }
 0x10e   : > { %748 = vmatpush.bf16.msrb.mxu0 %v596_v34  ;;  %787 = vmatpush.bf16.msrb.mxu1 %v597_v35 }
 0x111   : > { %825 = vmatpush.bf16.msrb.mxu2 %v602_v52  ;;  %864 = vmatpush.bf16.msrb.mxu3 %v603_v53 }
 0x112   : > { %2135 = vmatmul.msk.bf16.vlgmr.msrb.gmra.mxu0 %vm722_vm1, %v2227_v31  ;;  %2141 = vmatmul.msk.bf16.vlgmr.msrb.gmra.mxu1 %vm722_vm1, %v2227_v31 }
 0x114   : > { %639 = vperm.xlu2 %2296, %v2776_v61  }
 0x115   : > { %826 = vmatpush.bf16.msrb.mxu2 %v598_v56  ;;  %865 = vmatpush.bf16.msrb.mxu3 %v599_v23 }
 0x118   : > { %2147 = vmatmul.msk.bf16.vlgmr.msrb.gmra.mxu2 %vm722_vm1, %v2227_v31  ;;  %2153 = vmatmul.msk.bf16.vlgmr.msrb.gmra.mxu3 %vm722_vm1, %v2227_v31  ;;  %v2869_v31 = vpop.permute.xlu1 %679 }
 0x122   : > { %2136 = vmatmul.msk.bf16.gmra.mxu0 %vm722_vm1, %v2228_v57  ;;  %2142 = vmatmul.msk.bf16.gmra.mxu1 %vm722_vm1, %v2228_v57 }
 0x128   : > { %2148 = vmatmul.msk.bf16.gmra.mxu2 %vm722_vm1, %v2228_v57  ;;  %2154 = vmatmul.msk.bf16.gmra.mxu3 %vm722_vm1, %v2228_v57 }
 0x132   : > { %2137 = vmatmul.msk.bf16.gmra.mxu0 %vm722_vm1, %v2229_v0  ;;  %2143 = vmatmul.msk.bf16.gmra.mxu1 %vm722_vm1, %v2229_v0 }
 0x138   : > { %2149 = vmatmul.msk.bf16.gmra.mxu2 %vm722_vm1, %v2229_v0  ;;  %2155 = vmatmul.msk.bf16.gmra.mxu3 %vm722_vm1, %v2229_v0 }
 0x142   : > { %2138 = vmatmul.msk.bf16.gmra.mxu0 %vm722_vm1, %v2230_v40  ;;  %2144 = vmatmul.msk.bf16.gmra.mxu1 %vm722_vm1, %v2230_v40 }
 0x148   : > { %2150 = vmatmul.msk.bf16.gmra.mxu2 %vm722_vm1, %v2230_v40  ;;  %2156 = vmatmul.msk.bf16.gmra.mxu3 %vm722_vm1, %v2230_v40 }
 0x150   : > { %v2863_v34 = vpop.permute.xlu0 %684 }
 0x152   : > { %2139 = vmatmul.msk.bf16.gmra.mxu0 %vm722_vm1, %v2231_v1  ;;  %2145 = vmatmul.msk.bf16.gmra.mxu1 %vm722_vm1, %v2231_v1 }
 0x156   : > { %v2861_v12 = vpop.permute.xlu2 %664 }
 0x158   : > { %2151 = vmatmul.msk.bf16.gmra.mxu2 %vm722_vm1, %v2231_v1  ;;  %2157 = vmatmul.msk.bf16.gmra.mxu3 %vm722_vm1, %v2231_v1 }
 0x15e   : > { %v2871_v49 = vpop.permute.xlu2 %669 }
 0x162   : > { %2140 = vmatmul.msk.bf16.gmra.mxu0 %vm722_vm1, %v2232_v41  ;;  %2146 = vmatmul.msk.bf16.gmra.mxu1 %vm722_vm1, %v2232_v41 }
 0x166   : > { %v2881_v57 = vpop.permute.xlu2 %644 }
 0x168   : > { %2152 = vmatmul.msk.bf16.gmra.mxu2 %vm722_vm1, %v2232_v41  ;;  %2158 = vmatmul.msk.bf16.gmra.mxu3 %vm722_vm1, %v2232_v41 }
 0x16a   : > { %v2877_v27 = vpop.permute.xlu0 %689 }
 0x16b   : > { %v2879_v23 = vpop.permute.xlu1 %659 }
 0x172   : > { %v2891_v61 = vpop.permute.xlu0 %654 }
 0x18f   : > { %v2807_v44 = vpop.f32.mrf.mxu0  ;;  %v2809_v45 = vpop.f32.mrf.mxu1 }
 0x197   : > { %v2811_v62 = vpop.f32.mrf.mxu0  ;;  %v2813_v63 = vpop.f32.mrf.mxu1 }
 0x19b   : > { %v2815_v33 = vpop.f32.mrf.mxu2  ;;  %v2817_v2 = vpop.f32.mrf.mxu3 }
 0x19c   : > { %3300 = vst [vmem:[#allocation11_spill] sm:$0xff] %v2815_v33 }
 0x19d   : > { %3301 = vst [vmem:[#allocation12_spill] sm:$0xff] %v2817_v2 }
 0x19f   : > { %v2819_v54 = vpop.f32.mrf.mxu0  ;;  %v2821_v55 = vpop.f32.mrf.mxu1 }
 0x1a3   : > { %v2823_v36 = vpop.f32.mrf.mxu2  ;;  %v2825_v37 = vpop.f32.mrf.mxu3 }
 0x1a4   : > { %3302 = vst [vmem:[#allocation13_spill] sm:$0xff] %v2823_v36 }
 0x1a5   : > { %3303 = vst [vmem:[#allocation14_spill] sm:$0xff] %v2825_v37 }
 0x1a7   : > { %v2827_v3 = vpop.f32.mrf.mxu0  ;;  %v2829_v4 = vpop.f32.mrf.mxu1 }
 0x1ab   : > { %v2831_v50 = vpop.f32.mrf.mxu2  ;;  %v2833_v51 = vpop.f32.mrf.mxu3 }
 0x1ac   : > { %3304 = vst [vmem:[#allocation15_spill] sm:$0xff] %v2831_v50 }
 0x1ad   : > { %3305 = vst [vmem:[#allocation16_spill] sm:$0xff] %v2833_v51 }
 0x1af   : > { %v2835_v5 = vpop.f32.mrf.mxu0  ;;  %v2837_v6 = vpop.f32.mrf.mxu1 }
 0x1b3   : > { %v2839_v24 = vpop.f32.mrf.mxu2  ;;  %v2841_v25 = vpop.f32.mrf.mxu3 }
 0x1b4   : > { %3306 = vst [vmem:[#allocation17_spill] sm:$0xff] %v2839_v24  ;;  %v2404_v24 = vmov 1  }
 0x1b5   : > { %3307 = vst [vmem:[#allocation18_spill] sm:$0xff] %v2841_v25  ;;  %2297 = vset.pattern.permute.xlu0 %v2404_v24  ;;  %2298 = vset.pattern.permute.xlu1 %v2404_v24 }
 0x1b6   : > { %1027 = vperm.xlu0 %2297, %v2733_v26   ;;  %1023 = vperm.xlu1 %2298, %v2704_v16  }
 0x1b7   : > { %v2843_v46 = vpop.f32.mrf.mxu0  ;;  %v2845_v47 = vpop.f32.mrf.mxu1  ;;  %2299 = vset.pattern.permute.xlu2 %v2404_v24 }
 0x1b8   : > { %1019 = vperm.xlu2 %2299, %v2668_v10  }
 0x1bb   : > { %v2847_v7 = vpop.f32.mrf.mxu2  ;;  %v2849_v28 = vpop.f32.mrf.mxu3 }
 0x1bc   : > { %3308 = vst [vmem:[#allocation19_spill] sm:$0xff] %v2847_v7 }
 0x1bd   : > { %3309 = vst [vmem:[#allocation20_spill] sm:$0xff] %v2849_v28 }
 0x1be   : > { %1007 = vperm.xlu0 %2297, %v2716_v20   ;;  %1015 = vperm.xlu1 %2298, %v2662_v58  }
 0x1bf   : > { %v765_v8 = vpop.f32.mrf.mxu0  ;;  %v804_v29 = vpop.f32.mrf.mxu1 }
 0x1c0   : > { %1011 = vperm.xlu2 %2299, %v2745_v18  }
 0x1c3   : > { %v2851_v9 = vpop.f32.mrf.mxu2  ;;  %v2853_v42 = vpop.f32.mrf.mxu3 }
 0x1c6   : > { %995 = vperm.xlu0 %2297, %v2765_v60   ;;  %v841_v60 = vadd.f32 %v2851_v9, %v2879_v23  ;;  %1003 = vperm.xlu1 %2298, %v2682_v32   ;;  %v3311_v9 = vld [vmem:[#allocation20_spill] sm:$0xff]  ;;  %v3312_v32 = vld [vmem:[#allocation17_spill] sm:$0xff] }
 0x1c7   : > { %v767_v11 = vpop.f32.mrf.mxu0  ;;  %v806_v43 = vpop.f32.mrf.mxu1 }
 0x1c8   : > { %v768_v26 = vadd.f32 %v767_v11, %v2871_v49  ;;  %999 = vperm.xlu2 %2299, %v2750_v19   ;;  %v3313_v19 = vld [vmem:[#allocation18_spill] sm:$0xff] }
 0x1cb   : > { %v2855_v38 = vpop.f32.mrf.mxu2  ;;  %v2857_v39 = vpop.f32.mrf.mxu3 }
 0x1cf   : > { %v770_v13 = vpop.f32.mrf.mxu0  ;;  %v809_v14 = vpop.f32.mrf.mxu1 }
 0x1d0   : > { %v771_v2 = vadd.f32 %v770_v13, %v2859_v21  ;;  %v810_v33 = vadd.f32 %v809_v14, %v2859_v21 }
 0x1d2   : > { %v930_v13 = vmax.f32 %v810_v33, 0.0 }
 0x1d3   : > { %v2865_v35 = vpop.f32.mrf.mxu2  ;;  %v2867_v15 = vpop.f32.mrf.mxu3 }
 0x1d7   : > { %v772_v48 = vpop.f32.mrf.mxu0  ;;  %v811_v30 = vpop.f32.mrf.mxu1 }
 0x1d8   : > { %v773_v59 = vadd.f32 %v772_v48, %v2869_v31  ;;  %v812_v37 = vadd.f32 %v811_v30, %v2869_v31  ;;  %v766_v30 = vadd.f32 %v765_v8, %v2861_v12 }
 0x1da   : > { %v933_v14 = vmax.f32 %v773_v59, 0.0  ;;  %v934_v28 = vmax.f32 %v812_v37, 0.0  ;;  %v807_v59 = vadd.f32 %v806_v43, %v2871_v49  ;;  %v925_v43 = vmax.f32 %v768_v26, 0.0 }
 0x1db   : > { %v2873_v52 = vpop.f32.mrf.mxu2  ;;  %v2875_v53 = vpop.f32.mrf.mxu3 }
 0x1df   : > { %v775_v22 = vpop.f32.mrf.mxu0  ;;  %v814_v56 = vpop.f32.mrf.mxu1 }
 0x1e0   : > { %v776_v1 = vadd.f32 %v775_v22, %v2863_v34  ;;  %v815_v41 = vadd.f32 %v814_v56, %v2863_v34  ;;  %v929_v56 = vmax.f32 %v771_v2, 0.0  ;;  %v2902_v2 = vpop.permute.xlu1 %634 }
 0x1e1   : > { %v2908_v16 = vadd.f32 %v2807_v44, %v2902_v2  ;;  %v2912_v24 = vadd.f32 %v2809_v45, %v2902_v2  ;;  %v800_v44 = vadd.f32 %v2837_v6, %v2891_v61  ;;  %v763_v45 = vadd.f32 %v2843_v46, %v2879_v23 }
 0x1e2   : > { %v937_v50 = vmax.f32 %v776_v1, 0.0  ;;  %v938_v17 = vmax.f32 %v815_v41, 0.0  ;;  %v974_v8 = vpack.c.bf16 %v933_v14, %v929_v56  ;;  %v756_v41 = vadd.f32 %v2819_v54, %v2881_v57 }
 0x1e3   : > { %v2883_v0 = vpop.f32.mrf.mxu2  ;;  %v2885_v40 = vpop.f32.mrf.mxu3 }
 0x1e7   : > { %v777_v36 = vpop.f32.mrf.mxu0  ;;  %v816_v51 = vpop.f32.mrf.mxu1 }
 0x1e8   : > { %v778_v25 = vadd.f32 %v777_v36, %v2877_v27  ;;  %v817_v22 = vadd.f32 %v816_v51, %v2877_v27  ;;  %v805_v36 = vadd.f32 %v804_v29, %v2861_v12  ;;  %v975_v29 = vpack.c.bf16 %v934_v28, %v930_v13 }
 0x1e9   : > { %v926_v28 = vmax.f32 %v807_v59, 0.0  ;;  %v917_v13 = vmax.f32 %v763_v45, 0.0 }
 0x1ea   : > { %v941_v48 = vmax.f32 %v778_v25, 0.0  ;;  %v942_v7 = vmax.f32 %v817_v22, 0.0  ;;  %v2914_v25 = vpop.permute.xlu2 %639  ;;  %v922_v11 = vmax.f32 %v805_v36, 0.0  ;;  %v905_v36 = vmax.f32 %v756_v41, 0.0 }
 0x1eb   : > { %v853_v1 = vpop.f32.mrf.mxu2  ;;  %v892_v51 = vpop.f32.mrf.mxu3  ;;  %v2918_v10 = vadd.f32 %v2811_v62, %v2914_v25  ;;  %v921_v62 = vmax.f32 %v766_v30, 0.0  ;;  %v2936_v6 = vadd.f32 %v2813_v63, %v2914_v25 }
 0x1ec   : > { %v978_v33 = vpack.c.bf16 %v941_v48, %v937_v50  ;;  %v979_v37 = vpack.c.bf16 %v942_v7, %v938_v17  ;;  %v761_v17 = vadd.f32 %v2835_v5, %v2891_v61  ;;  %v802_v50 = vadd.f32 %v2845_v47, %v2879_v23  ;;  %v2928_v7 = vpop.permute.xlu0 %649 }
 0x1ed   : > { %v795_v5 = vadd.f32 %v2821_v55, %v2881_v57  ;;  %v758_v46 = vadd.f32 %v2827_v3, %v2928_v7  ;;  %v797_v47 = vadd.f32 %v2829_v4, %v2928_v7  ;;  %v854_v22 = vadd.f32 %v853_v1, %v2863_v34 }
 0x1ee   : > { %1080 = vmatpush.bf16.msra.mxu0 %v978_v33  ;;  %1119 = vmatpush.bf16.msra.mxu1 %v979_v37  ;;  %v893_v56 = vadd.f32 %v892_v51, %v2863_v34  ;;  %v913_v54 = vmax.f32 %v761_v17, 0.0  ;;  %v914_v55 = vmax.f32 %v800_v44, 0.0  ;;  %v918_v14 = vmax.f32 %v802_v50, 0.0 }
 0x1ef   : > { %v970_v20 = vpack.c.bf16 %v925_v43, %v921_v62  ;;  %v971_v3 = vpack.c.bf16 %v926_v28, %v922_v11  ;;  %v851_v34 = vadd.f32 %v2883_v0, %v2869_v31  ;;  %v890_v1 = vadd.f32 %v2885_v40, %v2869_v31  ;;  %v3310_v28 = vld [vmem:[#allocation19_spill] sm:$0xff] }
 0x1f0   : > { %v909_v51 = vmax.f32 %v758_v46, 0.0  ;;  %v939_v26 = vmax.f32 %v854_v22, 0.0  ;;  %v940_v59 = vmax.f32 %v893_v56, 0.0  ;;  %v906_v18 = vmax.f32 %v795_v5, 0.0 }
 0x1f1   : > { %v849_v37 = vadd.f32 %v2873_v52, %v2859_v21  ;;  %v967_v0 = vpack.c.bf16 %v918_v14, %v914_v55  ;;  %v846_v31 = vadd.f32 %v2865_v35, %v2871_v49  ;;  %v885_v40 = vadd.f32 %v2867_v15, %v2871_v49  ;;  %v3314_v14 = vld [vmem:[#allocation8_spill] sm:$0xff] }
 0x1f2   : > { %1081 = vmatpush.bf16.msra.mxu0 %v974_v8  ;;  %1120 = vmatpush.bf16.msra.mxu1 %v975_v29  ;;  %v910_v8 = vmax.f32 %v797_v47, 0.0  ;;  %v966_v29 = vpack.c.bf16 %v917_v13, %v913_v54  ;;  %v935_v45 = vmax.f32 %v851_v34, 0.0  ;;  %v936_v50 = vmax.f32 %v890_v1, 0.0  ;;  %v3318_v34 = vld [vmem:[#allocation14_spill] sm:$0xff] }
 0x1f3   : > { %v855_v63 = vpop.f32.mrf.mxu2  ;;  %v894_v48 = vpop.f32.mrf.mxu3  ;;  %v962_v52 = vpack.c.bf16 %v909_v51, %v905_v36  ;;  %v898_v62 = vmax.f32 %v2912_v24, 0.0  ;;  %v844_v11 = vadd.f32 %v2855_v38, %v2861_v12  ;;  %v883_v35 = vadd.f32 %v2857_v39, %v2861_v12  ;;  %983 = vperm.xlu0 %2297, %v3314_v14   ;;  %v3319_v51 = vld [vmem:[#allocation9_spill] sm:$0xff] }
 0x1f4   : > { %v856_v4 = vadd.f32 %v855_v63, %v2877_v27  ;;  %v895_v30 = vadd.f32 %v894_v48, %v2877_v27  ;;  %v888_v27 = vadd.f32 %v2875_v53, %v2859_v21  ;;  %v897_v21 = vmax.f32 %v2908_v16, 0.0  ;;  %v3315_v63 = vld [vmem:[#allocation15_spill] sm:$0xff]  ;;  %991 = vperm.xlu1 %2298, %v3319_v51  }
 0x1f5   : > { %v901_v53 = vmax.f32 %v2918_v10, 0.0  ;;  %v931_v15 = vmax.f32 %v849_v37, 0.0  ;;  %v880_v16 = vadd.f32 %v2853_v42, %v2879_v23  ;;  %v963_v43 = vpack.c.bf16 %v910_v8, %v906_v18 }
 0x1f6   : > { %v943_v33 = vmax.f32 %v856_v4, 0.0  ;;  %v944_v58 = vmax.f32 %v895_v30, 0.0  ;;  %1082 = vmatpush.bf16.msra.mxu0 %v970_v20  ;;  %1121 = vmatpush.bf16.msra.mxu1 %v971_v3  ;;  %v932_v49 = vmax.f32 %v888_v27, 0.0  ;;  %v902_v10 = vmax.f32 %v2936_v6, 0.0  ;;  %v3316_v20 = vld [vmem:[#allocation16_spill] sm:$0xff]  ;;  %v3317_v30 = vld [vmem:[#allocation13_spill] sm:$0xff] }
 0x1f7   : > { %v927_v38 = vmax.f32 %v846_v31, 0.0  ;;  %v928_v24 = vmax.f32 %v885_v40, 0.0  ;;  %v976_v39 = vpack.c.bf16 %v935_v45, %v931_v15  ;;  %v839_v41 = vadd.f32 %v3310_v28, %v2891_v61  ;;  %v3322_v27 = vld [vmem:[#allocation12_spill] sm:$0xff] }
 0x1f8   : > { %v980_v17 = vpack.c.bf16 %v943_v33, %v939_v26  ;;  %v981_v44 = vpack.c.bf16 %v944_v58, %v940_v59  ;;  %v977_v12 = vpack.c.bf16 %v936_v50, %v932_v49  ;;  %v878_v5 = vadd.f32 %v3311_v9, %v2891_v61  ;;  %v2233_v61 = vld [vmem:[%s3287_s2 + $0x30] sm:$0xff]  ;;  %v3320_v26 = vld [vmem:[#allocation10_spill] sm:$0xff] }
 0x1f9   : > { %v923_v42 = vmax.f32 %v844_v11, 0.0  ;;  %v924_v23 = vmax.f32 %v883_v35, 0.0  ;;  %v836_v6 = vadd.f32 %v3312_v32, %v2928_v7  ;;  %v875_v46 = vadd.f32 %v3313_v19, %v2928_v7  ;;  %987 = vperm.xlu2 %2299, %v3320_v26   ;;  %v2238_v11 = vld [vmem:[%s3287_s2 + $0x58] sm:$0xff] }
 0x1fa   : > { %1083 = vmatpush.bf16.msra.mxu0 %v966_v29  ;;  %1122 = vmatpush.bf16.msra.mxu1 %v967_v0  ;;  %v958_v47 = vpack.c.bf16 %v901_v53, %v897_v21  ;;  %v959_v22 = vpack.c.bf16 %v902_v10, %v898_v62  ;;  %v919_v56 = vmax.f32 %v841_v60, 0.0  ;;  %v920_v54 = vmax.f32 %v880_v16, 0.0  ;;  %v2235_v21 = vld [vmem:[%s3287_s2 + $0x40] sm:$0xff]  ;;  %v2236_v53 = vld [vmem:[%s3287_s2 + $0x48] sm:$0xff]  ;;  %v2237_v62 = vld [vmem:[%s3287_s2 + $0x50] sm:$0xff] }
 0x1fb   : > { %1158 = vmatpush.bf16.msra.mxu2 %v980_v17  ;;  %1197 = vmatpush.bf16.msra.mxu3 %v981_v44  ;;  %v972_v55 = vpack.c.bf16 %v927_v38, %v923_v42  ;;  %v973_v13 = vpack.c.bf16 %v928_v24, %v924_v23  ;;  %v834_v48 = vadd.f32 %v3315_v63, %v2881_v57  ;;  %v915_v3 = vmax.f32 %v839_v41, 0.0 }
 0x1fc   : > { %v873_v7 = vadd.f32 %v3316_v20, %v2881_v57  ;;  %v916_v4 = vmax.f32 %v878_v5, 0.0  ;;  %v831_v36 = vadd.f32 %v3317_v30, %v2914_v25  ;;  %v870_v1 = vadd.f32 %v3318_v34, %v2914_v25  ;;  %v3321_v57 = vld [vmem:[#allocation11_spill] sm:$0xff] }
 0x1fd   : > { %v911_v59 = vmax.f32 %v836_v6, 0.0  ;;  %v912_v33 = vmax.f32 %v875_v46, 0.0  ;;  %v968_v58 = vpack.c.bf16 %v919_v56, %v915_v3  ;;  %v829_v37 = vadd.f32 %v3321_v57, %v2902_v2 }
 0x1fe   : > { %1084 = vmatpush.bf16.msra.mxu0 %v962_v52  ;;  %1123 = vmatpush.bf16.msra.mxu1 %v963_v43  ;;  %v969_v18 = vpack.c.bf16 %v920_v54, %v916_v4  ;;  %v868_v8 = vadd.f32 %v3322_v27, %v2902_v2  ;;  %v907_v29 = vmax.f32 %v834_v48, 0.0  ;;  %v908_v25 = vmax.f32 %v873_v7, 0.0  ;;  %v2234_v2 = vld [vmem:[%s3287_s2 + $0x38] sm:$0xff] }
 0x1ff   : > { %1159 = vmatpush.bf16.msra.mxu2 %v976_v39  ;;  %1198 = vmatpush.bf16.msra.mxu3 %v977_v12  ;;  %v903_v0 = vmax.f32 %v831_v36, 0.0  ;;  %v904_v17 = vmax.f32 %v870_v1, 0.0  ;;  %v899_v40 = vmax.f32 %v829_v37, 0.0 }
 0x200   : > { %v964_v44 = vpack.c.bf16 %v911_v59, %v907_v29  ;;  %v965_v31 = vpack.c.bf16 %v912_v33, %v908_v25  ;;  %v900_v45 = vmax.f32 %v868_v8, 0.0 }
 0x201   : > { %v960_v50 = vpack.c.bf16 %v903_v0, %v899_v40 }
 0x202   : > { %1085 = vmatpush.bf16.msra.mxu0 %v958_v47  ;;  %1124 = vmatpush.bf16.msra.mxu1 %v959_v22  ;;  %v961_v52 = vpack.c.bf16 %v904_v17, %v900_v45 }
 0x203   : > { %1160 = vmatpush.bf16.msra.mxu2 %v972_v55  ;;  %1199 = vmatpush.bf16.msra.mxu3 %v973_v13 }
 0x205   : > { %2195 = vmatmul.msk.bf16.vlgmr.msra.gmra.mxu0 %vm722_vm1, %v2233_v61  ;;  %2201 = vmatmul.msk.bf16.vlgmr.msra.gmra.mxu1 %vm722_vm1, %v2233_v61 }
 0x207   : > { %1161 = vmatpush.bf16.msra.mxu2 %v968_v58  ;;  %1200 = vmatpush.bf16.msra.mxu3 %v969_v18 }
 0x20b   : > { %1162 = vmatpush.bf16.msra.mxu2 %v964_v44  ;;  %1201 = vmatpush.bf16.msra.mxu3 %v965_v31 }
 0x20f   : > { %1163 = vmatpush.bf16.msra.mxu2 %v960_v50  ;;  %1202 = vmatpush.bf16.msra.mxu3 %v961_v52 }
 0x212   : > { %2207 = vmatmul.msk.bf16.vlgmr.msra.gmra.mxu2 %vm722_vm1, %v2233_v61  ;;  %2213 = vmatmul.msk.bf16.vlgmr.msra.gmra.mxu3 %vm722_vm1, %v2233_v61  ;;  %v3099_v34 = vpop.permute.xlu2 %1019 }
 0x215   : > { %2196 = vmatmul.msk.bf16.gmra.mxu0 %vm722_vm1, %v2234_v2  ;;  %2202 = vmatmul.msk.bf16.gmra.mxu1 %vm722_vm1, %v2234_v2 }
 0x21a   : > { %v3109_v18 = vpop.permute.xlu2 %1011 }
 0x222   : > { %2208 = vmatmul.msk.bf16.gmra.mxu2 %vm722_vm1, %v2234_v2  ;;  %2214 = vmatmul.msk.bf16.gmra.mxu3 %vm722_vm1, %v2234_v2 }
 0x225   : > { %2197 = vmatmul.msk.bf16.gmra.mxu0 %vm722_vm1, %v2235_v21  ;;  %2203 = vmatmul.msk.bf16.gmra.mxu1 %vm722_vm1, %v2235_v21 }
 0x228   : > { %v3093_v4 = vpop.permute.xlu1 %1023  ;;  %v3101_v1 = vpop.permute.xlu0 %1027 }
 0x230   : > { %v3107_v58 = vpop.permute.xlu1 %1015  ;;  %v3111_v57 = vpop.permute.xlu0 %1007 }
 0x232   : > { %2209 = vmatmul.msk.bf16.gmra.mxu2 %vm722_vm1, %v2235_v21  ;;  %2215 = vmatmul.msk.bf16.gmra.mxu3 %vm722_vm1, %v2235_v21 }
 0x235   : > { %2198 = vmatmul.msk.bf16.gmra.mxu0 %vm722_vm1, %v2236_v53  ;;  %2204 = vmatmul.msk.bf16.gmra.mxu1 %vm722_vm1, %v2236_v53 }
 0x242   : > { %2210 = vmatmul.msk.bf16.gmra.mxu2 %vm722_vm1, %v2236_v53  ;;  %2216 = vmatmul.msk.bf16.gmra.mxu3 %vm722_vm1, %v2236_v53 }
 0x245   : > { %2199 = vmatmul.msk.bf16.gmra.mxu0 %vm722_vm1, %v2237_v62  ;;  %2205 = vmatmul.msk.bf16.gmra.mxu1 %vm722_vm1, %v2237_v62 }
 0x252   : > { %2211 = vmatmul.msk.bf16.gmra.mxu2 %vm722_vm1, %v2237_v62  ;;  %2217 = vmatmul.msk.bf16.gmra.mxu3 %vm722_vm1, %v2237_v62 }
 0x255   : > { %2200 = vmatmul.msk.bf16.gmra.mxu0 %vm722_vm1, %v2238_v11  ;;  %2206 = vmatmul.msk.bf16.gmra.mxu1 %vm722_vm1, %v2238_v11 }
 0x262   : > { %2212 = vmatmul.msk.bf16.gmra.mxu2 %vm722_vm1, %v2238_v11  ;;  %2218 = vmatmul.msk.bf16.gmra.mxu3 %vm722_vm1, %v2238_v11 }
 0x282   : > { %v3041_v35 = vpop.f32.mrf.mxu0  ;;  %v3043_v15 = vpop.f32.mrf.mxu1 }
 0x28a   : > { %v3045_v49 = vpop.f32.mrf.mxu0  ;;  %v3047_v60 = vpop.f32.mrf.mxu1 }
 0x292   : > { %v3049_v16 = vpop.f32.mrf.mxu0  ;;  %v3051_v43 = vpop.f32.mrf.mxu1 }
 0x295   : > { %v3053_v10 = vpop.f32.mrf.mxu2  ;;  %v3055_v38 = vpop.f32.mrf.mxu3 }
 0x29a   : > { %v3057_v24 = vpop.f32.mrf.mxu0  ;;  %v3059_v39 = vpop.f32.mrf.mxu1 }
 0x29d   : > { %v3061_v12 = vpop.f32.mrf.mxu2  ;;  %v3063_v28 = vpop.f32.mrf.mxu3 }
 0x2a2   : > { %v3065_v41 = vpop.f32.mrf.mxu0  ;;  %v3067_v9 = vpop.f32.mrf.mxu1 }
 0x2a5   : > { %v3069_v5 = vpop.f32.mrf.mxu2  ;;  %v3071_v42 = vpop.f32.mrf.mxu3 }
 0x2aa   : > { %v3073_v23 = vpop.f32.mrf.mxu0  ;;  %v3075_v32 = vpop.f32.mrf.mxu1 }
 0x2ad   : > { %v3077_v6 = vpop.f32.mrf.mxu2  ;;  %v3079_v19 = vpop.f32.mrf.mxu3 }
 0x2b2   : > { %v1102_v46 = vpop.f32.mrf.mxu0  ;;  %v1141_v47 = vpop.f32.mrf.mxu1 }
 0x2b5   : > { %v3081_v22 = vpop.f32.mrf.mxu2  ;;  %v3083_v56 = vpop.f32.mrf.mxu3 }
 0x2ba   : > { %v1104_v54 = vpop.f32.mrf.mxu0  ;;  %v1143_v55 = vpop.f32.mrf.mxu1 }
 0x2bd   : > { %v3085_v13 = vpop.f32.mrf.mxu2  ;;  %v3087_v61 = vpop.f32.mrf.mxu3 }
 0x2c2   : > { %v1107_v14 = vpop.f32.mrf.mxu0  ;;  %v1146_v63 = vpop.f32.mrf.mxu1 }
 0x2c3   : > { %v1108_v21 = vadd.f32 %v1107_v14, %v3107_v58  ;;  %v1147_v53 = vadd.f32 %v1146_v63, %v3107_v58  ;;  %v2405_v14 = vmov 2   ;;  %v1103_v63 = vadd.f32 %v1102_v46, %v3111_v57 }
 0x2c4   : > { %2300 = vset.pattern.permute.xlu1 %v2405_v14  ;;  %2301 = vset.pattern.permute.xlu0 %v2405_v14 }
 0x2c5   : > { %v3089_v48 = vpop.f32.mrf.mxu2  ;;  %v3091_v20 = vpop.f32.mrf.mxu3 }
 0x2ca   : > { %v1109_v7 = vpop.f32.mrf.mxu0  ;;  %v1148_v3 = vpop.f32.mrf.mxu1 }
 0x2cb   : > { %v1110_v25 = vadd.f32 %v1109_v7, %v3099_v34  ;;  %v1149_v0 = vadd.f32 %v1148_v3, %v3099_v34  ;;  %v3125_v7 = vpop.permute.xlu1 %1003  ;;  %v1105_v3 = vadd.f32 %v1104_v54, %v3109_v18  ;;  %v3136_v54 = vpop.permute.xlu0 %995 }
 0x2cd   : > { %v3095_v30 = vpop.f32.mrf.mxu2  ;;  %v3097_v36 = vpop.f32.mrf.mxu3  ;;  %v1270_v62 = vmax.f32 %v1110_v25, 0.0  ;;  %v1271_v11 = vmax.f32 %v1149_v0, 0.0  ;;  %v1139_v25 = vadd.f32 %v3075_v32, %v3125_v7  ;;  %v1262_v0 = vmax.f32 %v1105_v3, 0.0 }
 0x2ce   : > { %v1134_v32 = vadd.f32 %v3059_v39, %v3136_v54 }
 0x2d0   : > { %v1247_v39 = vmax.f32 %v1134_v32, 0.0 }
 0x2d2   : > { %v1112_v51 = vpop.f32.mrf.mxu0  ;;  %v1151_v26 = vpop.f32.mrf.mxu1 }
 0x2d3   : > { %v1113_v37 = vadd.f32 %v1112_v51, %v3093_v4  ;;  %v1152_v27 = vadd.f32 %v1151_v26, %v3093_v4  ;;  %v1144_v51 = vadd.f32 %v1143_v55, %v3109_v18  ;;  %v1283_v26 = vld [vmem:[%s3288_s3] sm:$0x1]  ;;  %v1100_v55 = vadd.f32 %v3073_v23, %v3125_v7 }
 0x2d4   : > { %1286 = vperm.xlu1 %2300, %v1283_v26   ;;  %v1095_v23 = vadd.f32 %v3057_v24, %v3136_v54 }
 0x2d5   : > { %v3103_v59 = vpop.f32.mrf.mxu2  ;;  %v3105_v33 = vpop.f32.mrf.mxu3  ;;  %v1274_v31 = vmax.f32 %v1113_v37, 0.0  ;;  %v1275_v40 = vmax.f32 %v1152_v27, 0.0  ;;  %v1142_v27 = vadd.f32 %v1141_v47, %v3111_v57 }
 0x2d6   : > { %v3132_v37 = vpop.permute.xlu2 %999  ;;  %v1246_v3 = vmax.f32 %v1095_v23, 0.0 }
 0x2d7   : > { %v1098_v46 = vadd.f32 %v3065_v41, %v3132_v37  ;;  %v1137_v47 = vadd.f32 %v3067_v9, %v3132_v37 }
 0x2d9   : > { %v1250_v41 = vmax.f32 %v1098_v46, 0.0 }
 0x2da   : > { %v1114_v8 = vpop.f32.mrf.mxu0  ;;  %v1153_v29 = vpop.f32.mrf.mxu1 }
 0x2db   : > { %v1115_v17 = vadd.f32 %v1114_v8, %v3101_v1  ;;  %v1154_v44 = vadd.f32 %v1153_v29, %v3101_v1  ;;  %v1266_v8 = vmax.f32 %v1108_v21, 0.0  ;;  %v1267_v29 = vmax.f32 %v1147_v53, 0.0  ;;  %v3150_v53 = vpop.permute.xlu1 %991 }
 0x2dc   : > { %v1255_v21 = vmax.f32 %v1139_v25, 0.0  ;;  %v1093_v9 = vadd.f32 %v3049_v16, %v3150_v53 }
 0x2dd   : > { %v1278_v45 = vmax.f32 %v1115_v17, 0.0  ;;  %v1279_v50 = vmax.f32 %v1154_v44, 0.0  ;;  %v3119_v52 = vpop.f32.mrf.mxu2  ;;  %v3121_v2 = vpop.f32.mrf.mxu3  ;;  %v1263_v17 = vmax.f32 %v1144_v51, 0.0 }
 0x2de   : > { %v3156_v24 = vpop.permute.xlu2 %987 }
 0x2df   : > { %1296 = vmatpush.msrb.mxu0 %v1278_v45  ;;  %1316 = vmatpush.msrb.mxu1 %v1279_v50  ;;  %v1259_v45 = vmax.f32 %v1142_v27, 0.0  ;;  %v1254_v50 = vmax.f32 %v1100_v55, 0.0  ;;  %v1090_v51 = vadd.f32 %v3045_v49, %v3156_v24  ;;  %v1129_v26 = vadd.f32 %v3047_v60, %v3156_v24  ;;  %v3162_v27 = vpop.permute.xlu0 %983 }
 0x2e0   : > { %v1088_v49 = vadd.f32 %v3041_v35, %v3162_v27  ;;  %v1127_v60 = vadd.f32 %v3043_v15, %v3162_v27  ;;  %v1242_v55 = vmax.f32 %v1093_v9, 0.0  ;;  %v1186_v35 = vadd.f32 %v3103_v59, %v3107_v58  ;;  %v3187_v59 = vld [vmem:[%s3289_s4] sm:$0x1] }
 0x2e1   : > { %1297 = vmatpush.msrb.mxu0 %v1274_v31  ;;  %1317 = vmatpush.msrb.mxu1 %v1275_v40  ;;  %v1258_v40 = vmax.f32 %v1103_v63, 0.0  ;;  %v1225_v15 = vadd.f32 %v3105_v33, %v3107_v58  ;;  %v1181_v33 = vadd.f32 %v3089_v48, %v3111_v57  ;;  %v1217_v48 = vadd.f32 %v3087_v61, %v3125_v7  ;;  %v1488_v61 = vld [vmem:[#allocation2 + $0x3a0] sm:$0xff] }
 0x2e2   : > { %v1268_v58 = vmax.f32 %v1186_v35, 0.0  ;;  %v1215_v9 = vadd.f32 %v3083_v56, %v3132_v37  ;;  %v1484_v56 = vld [vmem:[#allocation2 + $0x380] sm:$0xff] }
 0x2e3   : > { %1298 = vmatpush.msrb.mxu0 %v1270_v62  ;;  %1318 = vmatpush.msrb.mxu1 %v1271_v11  ;;  %v1251_v62 = vmax.f32 %v1137_v47, 0.0  ;;  %v1132_v11 = vadd.f32 %v3051_v43, %v3150_v53  ;;  %v1269_v32 = vmax.f32 %v1225_v15, 0.0  ;;  %v1620_v35 = vld [vmem:[#allocation2 + $0x7c0] sm:$0xff] }
 0x2e4   : > { %v1396_v15 = vld [vmem:[#allocation2 + $0xc0] sm:$0xff] }
 0x2e5   : > { %v1190_v44 = vpop.f32.mrf.mxu2  ;;  %v1229_v31 = vpop.f32.mrf.mxu3  ;;  %1299 = vmatpush.msrb.mxu0 %v1266_v8  ;;  %1319 = vmatpush.msrb.mxu1 %v1267_v29  ;;  %v1243_v25 = vmax.f32 %v1132_v11, 0.0  ;;  %v1260_v11 = vmax.f32 %v1181_v33, 0.0  ;;  %v1544_v33 = vld [vmem:[#allocation2 + $0x560] sm:$0xff] }
 0x2e6   : > { %v1191_v16 = vadd.f32 %v1190_v44, %v3093_v4  ;;  %v1230_v43 = vadd.f32 %v1229_v31, %v3093_v4  ;;  %v1227_v4 = vadd.f32 %v3121_v2, %v3099_v34  ;;  %v1239_v31 = vmax.f32 %v1129_v26, 0.0 }
 0x2e7   : > { %1300 = vmatpush.msrb.mxu0 %v1262_v0  ;;  %1320 = vmatpush.msrb.mxu1 %v1263_v17  ;;  %v1188_v0 = vadd.f32 %v3119_v52, %v3099_v34  ;;  %v1234_v52 = vmax.f32 %v1088_v49, 0.0  ;;  %v1235_v34 = vmax.f32 %v1127_v60, 0.0  ;;  %v1183_v2 = vadd.f32 %v3095_v30, %v3109_v18 }
 0x2e8   : > { %v1276_v46 = vmax.f32 %v1191_v16, 0.0  ;;  %v1277_v47 = vmax.f32 %v1230_v43, 0.0  ;;  %v1273_v23 = vmax.f32 %v1227_v4, 0.0  ;;  %v1220_v30 = vadd.f32 %v3091_v20, %v3111_v57  ;;  %v1428_v57 = vld [vmem:[#allocation2 + $0x1c0] sm:$0xff] }
 0x2e9   : > { %1301 = vmatpush.msrb.mxu0 %v1258_v40  ;;  %1321 = vmatpush.msrb.mxu1 %v1259_v45  ;;  %v1222_v40 = vadd.f32 %v3097_v36, %v3109_v18  ;;  %v1272_v45 = vmax.f32 %v1188_v0, 0.0  ;;  %v1432_v36 = vld [vmem:[#allocation2 + $0x1e0] sm:$0xff]  ;;  %v1257_v26 = vmax.f32 %v1217_v48, 0.0  ;;  %v1253_v16 = vmax.f32 %v1215_v9, 0.0 }
 0x2ea   : > { %v1496_v18 = vld [vmem:[#allocation2 + $0x3e0] sm:$0xff]  ;;  %v1207_v43 = vadd.f32 %v3063_v28, %v3156_v24  ;;  %v1205_v49 = vadd.f32 %v3055_v38, %v3162_v27 }
 0x2eb   : > { %1302 = vmatpush.msrb.mxu0 %v1254_v50  ;;  %1322 = vmatpush.msrb.mxu1 %v1255_v21  ;;  %v1178_v50 = vadd.f32 %v3085_v13, %v3125_v7  ;;  %v1264_v21 = vmax.f32 %v1183_v2, 0.0  ;;  %v1265_v20 = vmax.f32 %v1222_v40, 0.0  ;;  %v1424_v13 = vld [vmem:[#allocation2 + $0x1a0] sm:$0xff]  ;;  %v1173_v7 = vadd.f32 %v3077_v6, %v3136_v54 }
 0x2ec   : > { %v1416_v6 = vld [vmem:[#allocation2 + $0x160] sm:$0xff] }
 0x2ed   : > { %v1192_v14 = vpop.f32.mrf.mxu2  ;;  %v1231_v63 = vpop.f32.mrf.mxu3  ;;  %1303 = vmatpush.msrb.mxu0 %v1250_v41  ;;  %1323 = vmatpush.msrb.mxu1 %v1251_v62  ;;  %v1492_v41 = vld [vmem:[#allocation2 + $0x3c0] sm:$0xff]  ;;  %v1176_v62 = vadd.f32 %v3081_v22, %v3132_v37  ;;  %v1171_v37 = vadd.f32 %v3069_v5, %v3150_v53 }
 0x2ee   : > { %v1193_v8 = vadd.f32 %v1192_v14, %v3101_v1  ;;  %v1232_v29 = vadd.f32 %v1231_v63, %v3101_v1  ;;  %v1238_v1 = vmax.f32 %v1090_v51, 0.0  ;;  %v1256_v51 = vmax.f32 %v1178_v50, 0.0  ;;  %v1420_v22 = vld [vmem:[#allocation2 + $0x180] sm:$0xff] }
 0x2ef   : > { %1304 = vmatpush.msrb.mxu0 %v1246_v3  ;;  %1324 = vmatpush.msrb.mxu1 %v1247_v39  ;;  %v1261_v3 = vmax.f32 %v1220_v30, 0.0  ;;  %v1212_v39 = vadd.f32 %v3079_v19, %v3136_v54  ;;  %v1210_v14 = vadd.f32 %v3071_v42, %v3150_v53  ;;  %v1252_v63 = vmax.f32 %v1176_v62, 0.0  ;;  %v1480_v19 = vld [vmem:[#allocation2 + $0x360] sm:$0xff] }
 0x2f0   : > { %v1280_v17 = vmax.f32 %v1193_v8, 0.0  ;;  %v1281_v44 = vmax.f32 %v1232_v29, 0.0  ;;  %v1168_v54 = vadd.f32 %v3061_v12, %v3156_v24  ;;  %v1248_v8 = vmax.f32 %v1173_v7, 0.0  ;;  %v1412_v5 = vld [vmem:[#allocation2 + $0x140] sm:$0xff]  ;;  %v1433_v7 = vld [vmem:[#allocation2 + $0x1e8] sm:$0xff] }
 0x2f1   : > { %1305 = vmatpush.msrb.mxu0 %v1242_v55  ;;  %1325 = vmatpush.msrb.mxu1 %v1243_v25  ;;  %v1249_v29 = vmax.f32 %v1212_v39, 0.0  ;;  %v1476_v42 = vld [vmem:[#allocation2 + $0x340] sm:$0xff]  ;;  %v1166_v53 = vadd.f32 %v3053_v10, %v3162_v27  ;;  %v1244_v60 = vmax.f32 %v1171_v37, 0.0  ;;  %v1245_v55 = vmax.f32 %v1210_v14, 0.0  ;;  %v1497_v39 = vld [vmem:[#allocation2 + $0x3e8] sm:$0xff] }
 0x2f2   : > { %1336 = vmatpush.msrb.mxu2 %v1280_v17  ;;  %1356 = vmatpush.msrb.mxu3 %v1281_v44  ;;  %v1408_v12 = vld [vmem:[#allocation2 + $0x120] sm:$0xff]  ;;  %v1240_v24 = vmax.f32 %v1168_v54, 0.0  ;;  %v1241_v25 = vmax.f32 %v1207_v43, 0.0  ;;  %v1237_v17 = vmax.f32 %v1205_v49, 0.0  ;;  %v1421_v54 = vld [vmem:[#allocation2 + $0x188] sm:$0xff] }
 0x2f3   : > { %1306 = vmatpush.msrb.mxu0 %v1238_v1  ;;  %1326 = vmatpush.msrb.mxu1 %v1239_v31  ;;  %v1472_v28 = vld [vmem:[#allocation2 + $0x320] sm:$0xff]  ;;  %v1236_v10 = vmax.f32 %v1166_v53, 0.0  ;;  %v1485_v43 = vld [vmem:[#allocation2 + $0x388] sm:$0xff] }
 0x2f4   : > { %1337 = vmatpush.msrb.mxu2 %v1276_v46  ;;  %1357 = vmatpush.msrb.mxu3 %v1277_v47  ;;  %v1404_v0 = vld [vmem:[#allocation2 + $0x100] sm:$0xff] }
 0x2f5   : > { %1307 = vmatpush.msrb.mxu0 %v1234_v52  ;;  %1327 = vmatpush.msrb.mxu1 %v1235_v34  ;;  %v1468_v4 = vld [vmem:[#allocation2 + $0x300] sm:$0xff] }
 0x2f6   : > { %1338 = vmatpush.msrb.mxu2 %v1272_v45  ;;  %1358 = vmatpush.msrb.mxu3 %v1273_v23  ;;  %v1560_v38 = vld [vmem:[#allocation2 + $0x5e0] sm:$0xff] }
 0x2f7   : > { %2219 = vmatmul.msk.f32.vlgmr.msrb.gmra.mxu0 %vm722_vm1, %v3187_v59  ;;  %2220 = vmatmul.msk.f32.vlgmr.msrb.gmra.mxu1 %vm722_vm1, %v3187_v59  ;;  %v1624_v27 = vld [vmem:[#allocation2 + $0x7e0] sm:$0xff] }
 0x2f8   : > { %1339 = vmatpush.msrb.mxu2 %v1268_v58  ;;  %1359 = vmatpush.msrb.mxu3 %v1269_v32  ;;  %v1400_v44 = vld [vmem:[#allocation2 + $0xe0] sm:$0xff] }
 0x2f9   : > { %1628 = vmatpush.msra.mxu0 %v1432_v36  ;;  %1648 = vmatpush.msra.mxu1 %v1496_v18  ;;  %v1464_v1 = vld [vmem:[#allocation2 + $0x2e0] sm:$0xff] }
 0x2fa   : > { %1340 = vmatpush.msrb.mxu2 %v1264_v21  ;;  %1360 = vmatpush.msrb.mxu3 %v1265_v20  ;;  %v1556_v31 = vld [vmem:[#allocation2 + $0x5c0] sm:$0xff] }
 0x2fb   : > { %1629 = vmatpush.msra.mxu0 %v1428_v57  ;;  %1649 = vmatpush.msra.mxu1 %v1492_v41  ;;  %v1460_v46 = vld [vmem:[#allocation2 + $0x2c0] sm:$0xff] }
 0x2fc   : > { %1341 = vmatpush.msrb.mxu2 %v1260_v11  ;;  %1361 = vmatpush.msrb.mxu3 %v1261_v3  ;;  %v1552_v47 = vld [vmem:[#allocation2 + $0x5a0] sm:$0xff] }
 0x2fd   : > { %1630 = vmatpush.msra.mxu0 %v1424_v13  ;;  %1650 = vmatpush.msra.mxu1 %v1488_v61  ;;  %v1616_v52 = vld [vmem:[#allocation2 + $0x7a0] sm:$0xff] }
 0x2fe   : > { %1342 = vmatpush.msrb.mxu2 %v1256_v51  ;;  %1362 = vmatpush.msrb.mxu3 %v1257_v26  ;;  %v1392_v34 = vld [vmem:[#allocation2 + $0xa0] sm:$0xff] }
 0x2ff   : > { %1631 = vmatpush.msra.mxu0 %v1420_v22  ;;  %1651 = vmatpush.msra.mxu1 %v1484_v56  ;;  %v1456_v2 = vld [vmem:[#allocation2 + $0x2a0] sm:$0xff]  ;;  %v1429_v22 = vld [vmem:[#allocation2 + $0x1c8] sm:$0xff] }
 0x300   : > { %1343 = vmatpush.msrb.mxu2 %v1252_v63  ;;  %1363 = vmatpush.msrb.mxu3 %v1253_v16  ;;  %v1548_v40 = vld [vmem:[#allocation2 + $0x580] sm:$0xff]  ;;  %v1493_v56 = vld [vmem:[#allocation2 + $0x3c8] sm:$0xff] }
 0x301   : > { %1632 = vmatpush.msra.mxu0 %v1416_v6  ;;  %1652 = vmatpush.msra.mxu1 %v1480_v19  ;;  %v1612_v45 = vld [vmem:[#allocation2 + $0x780] sm:$0xff]  ;;  %v1425_v63 = vld [vmem:[#allocation2 + $0x1a8] sm:$0xff] }
 0x302   : > { %1344 = vmatpush.msrb.mxu2 %v1248_v8  ;;  %1364 = vmatpush.msrb.mxu3 %v1249_v29  ;;  %v1388_v23 = vld [vmem:[#allocation2 + $0x80] sm:$0xff]  ;;  %v1489_v16 = vld [vmem:[#allocation2 + $0x3a8] sm:$0xff] }
 0x303   : > { %1633 = vmatpush.msra.mxu0 %v1412_v5  ;;  %1653 = vmatpush.msra.mxu1 %v1476_v42  ;;  %v1608_v30 = vld [vmem:[#allocation2 + $0x760] sm:$0xff]  ;;  %v1417_v5 = vld [vmem:[#allocation2 + $0x168] sm:$0xff] }
 0x304   : > { %1345 = vmatpush.msrb.mxu2 %v1244_v60  ;;  %1365 = vmatpush.msrb.mxu3 %v1245_v55  ;;  %v1384_v58 = vld [vmem:[#allocation2 + $0x60] sm:$0xff]  ;;  %v1481_v42 = vld [vmem:[#allocation2 + $0x368] sm:$0xff] }
 0x305   : > { %1634 = vmatpush.msra.mxu0 %v1408_v12  ;;  %1654 = vmatpush.msra.mxu1 %v1472_v28  ;;  %v1448_v32 = vld [vmem:[#allocation2 + $0x260] sm:$0xff]  ;;  %v1413_v60 = vld [vmem:[#allocation2 + $0x148] sm:$0xff] }
 0x306   : > { %1346 = vmatpush.msrb.mxu2 %v1240_v24  ;;  %1366 = vmatpush.msrb.mxu3 %v1241_v25  ;;  %v1540_v36 = vld [vmem:[#allocation2 + $0x540] sm:$0xff]  ;;  %v1477_v55 = vld [vmem:[#allocation2 + $0x348] sm:$0xff] }
 0x307   : > { %1635 = vmatpush.msra.mxu0 %v1404_v0  ;;  %1655 = vmatpush.msra.mxu1 %v1468_v4  ;;  %v1604_v18 = vld [vmem:[#allocation2 + $0x740] sm:$0xff]  ;;  %v1409_v24 = vld [vmem:[#allocation2 + $0x128] sm:$0xff] }
 0x308   : > { %1347 = vmatpush.msrb.mxu2 %v1236_v10  ;;  %1367 = vmatpush.msrb.mxu3 %v1237_v17  ;;  %v1380_v50 = vld [vmem:[#allocation2 + $0x40] sm:$0xff]  ;;  %v1473_v25 = vld [vmem:[#allocation2 + $0x328] sm:$0xff] }
 0x309   : > { %2221 = vmatmul.msk.f32.vlgmr.msrb.gmra.mxu2 %vm722_vm1, %v3187_v59  ;;  %2222 = vmatmul.msk.f32.vlgmr.msrb.gmra.mxu3 %vm722_vm1, %v3187_v59  ;;  %v1452_v59 = vld [vmem:[#allocation2 + $0x280] sm:$0xff]  ;;  %v1561_v10 = vld [vmem:[#allocation2 + $0x5e8] sm:$0xff] }
 0x30a   : > { %1668 = vmatpush.msra.mxu2 %v1560_v38  ;;  %1688 = vmatpush.msra.mxu3 %v1624_v27  ;;  %v1444_v48 = vld [vmem:[#allocation2 + $0x240] sm:$0xff]  ;;  %v1625_v17 = vld [vmem:[#allocation2 + $0x7e8] sm:$0xff] }
 0x30b   : > { %1636 = vmatpush.msra.mxu0 %v1400_v44  ;;  %1656 = vmatpush.msra.mxu1 %v1464_v1  ;;  %v1536_v21 = vld [vmem:[#allocation2 + $0x520] sm:$0xff]  ;;  %v1405_v38 = vld [vmem:[#allocation2 + $0x108] sm:$0xff] }
 0x30c   : > { %1669 = vmatpush.msra.mxu2 %v1556_v31  ;;  %1689 = vmatpush.msra.mxu3 %v1620_v35  ;;  %v1600_v20 = vld [vmem:[#allocation2 + $0x720] sm:$0xff]  ;;  %v1469_v27 = vld [vmem:[#allocation2 + $0x308] sm:$0xff] }
 0x30d   : > { %1637 = vmatpush.msra.mxu0 %v1396_v15  ;;  %1657 = vmatpush.msra.mxu1 %v1460_v46  ;;  %v1376_v57 = vld [vmem:[#allocation2 + $0x20] sm:$0xff]  ;;  %v1557_v44 = vld [vmem:[#allocation2 + $0x5c8] sm:$0xff] }
 0x30e   : > { %1670 = vmatpush.msra.mxu2 %v1552_v47  ;;  %1690 = vmatpush.msra.mxu3 %v1616_v52  ;;  %v1440_v41 = vld [vmem:[#allocation2 + $0x220] sm:$0xff]  ;;  %v1621_v1 = vld [vmem:[#allocation2 + $0x7c8] sm:$0xff] }
 0x30f   : > { %1638 = vmatpush.msra.mxu0 %v1392_v34  ;;  %1658 = vmatpush.msra.mxu1 %v1456_v2  ;;  %v1532_v62 = vld [vmem:[#allocation2 + $0x500] sm:$0xff]  ;;  %v1401_v31 = vld [vmem:[#allocation2 + $0xe8] sm:$0xff] }
 0x310   : > { %1671 = vmatpush.msra.mxu2 %v1548_v40  ;;  %1691 = vmatpush.msra.mxu3 %v1612_v45  ;;  %v1596_v9 = vld [vmem:[#allocation2 + $0x700] sm:$0xff]  ;;  %v1465_v35 = vld [vmem:[#allocation2 + $0x2e8] sm:$0xff] }
 0x311   : > { %1639 = vmatpush.msra.mxu0 %v1388_v23  ;;  %1659 = vmatpush.msra.mxu1 %v1452_v59  ;;  %v1372_v11 = vld [vmem:[#allocation2] sm:$0xff]  ;;  %v1553_v15 = vld [vmem:[#allocation2 + $0x5a8] sm:$0xff] }
 0x312   : > { %1672 = vmatpush.msra.mxu2 %v1544_v33  ;;  %1692 = vmatpush.msra.mxu3 %v1608_v30  ;;  %v1436_v3 = vld [vmem:[#allocation2 + $0x200] sm:$0xff]  ;;  %v1617_v46 = vld [vmem:[#allocation2 + $0x7a8] sm:$0xff] }
 0x313   : > { %1640 = vmatpush.msra.mxu0 %v1384_v58  ;;  %1660 = vmatpush.msra.mxu1 %v1448_v32  ;;  %v1528_v13 = vld [vmem:[#allocation2 + $0x4e0] sm:$0xff]  ;;  %v1397_v47 = vld [vmem:[#allocation2 + $0xc8] sm:$0xff] }
 0x314   : > { %1673 = vmatpush.msra.mxu2 %v1540_v36  ;;  %1693 = vmatpush.msra.mxu3 %v1604_v18  ;;  %v1592_v61 = vld [vmem:[#allocation2 + $0x6e0] sm:$0xff]  ;;  %v1461_v52 = vld [vmem:[#allocation2 + $0x2c8] sm:$0xff] }
 0x315   : > { %1641 = vmatpush.msra.mxu0 %v1380_v50  ;;  %1661 = vmatpush.msra.mxu1 %v1444_v48  ;;  %v1524_v51 = vld [vmem:[#allocation2 + $0x4c0] sm:$0xff]  ;;  %v1549_v34 = vld [vmem:[#allocation2 + $0x588] sm:$0xff] }
 0x316   : > { %1674 = vmatpush.msra.mxu2 %v1536_v21  ;;  %1694 = vmatpush.msra.mxu3 %v1600_v20  ;;  %v1588_v26 = vld [vmem:[#allocation2 + $0x6c0] sm:$0xff]  ;;  %v1613_v2 = vld [vmem:[#allocation2 + $0x788] sm:$0xff] }
 0x317   : > { %1642 = vmatpush.msra.mxu0 %v1376_v57  ;;  %1662 = vmatpush.msra.mxu1 %v1440_v41  ;;  %v1520_v37 = vld [vmem:[#allocation2 + $0x4a0] sm:$0xff]  ;;  %v1393_v40 = vld [vmem:[#allocation2 + $0xa8] sm:$0xff] }
 0x318   : > { %1675 = vmatpush.msra.mxu2 %v1532_v62  ;;  %1695 = vmatpush.msra.mxu3 %v1596_v9  ;;  %v1584_v14 = vld [vmem:[#allocation2 + $0x6a0] sm:$0xff]  ;;  %v1457_v45 = vld [vmem:[#allocation2 + $0x2a8] sm:$0xff] }
 0x319   : > { %1643 = vmatpush.msra.mxu0 %v1372_v11  ;;  %1663 = vmatpush.msra.mxu1 %v1436_v3  ;;  %v1516_v6 = vld [vmem:[#allocation2 + $0x480] sm:$0xff]  ;;  %v1545_v23 = vld [vmem:[#allocation2 + $0x568] sm:$0xff] }
 0x31a   : > { %1676 = vmatpush.msra.mxu2 %v1528_v13  ;;  %1696 = vmatpush.msra.mxu3 %v1592_v61  ;;  %v1580_v19 = vld [vmem:[#allocation2 + $0x680] sm:$0xff]  ;;  %v1609_v59 = vld [vmem:[#allocation2 + $0x768] sm:$0xff] }
 0x31b   : > { %1708 = vmatpush.msrb.mxu0 %v1433_v7  ;;  %1728 = vmatpush.msrb.mxu1 %v1497_v39  ;;  %v1512_v8 = vld [vmem:[#allocation2 + $0x460] sm:$0xff]  ;;  %v1389_v33 = vld [vmem:[#allocation2 + $0x88] sm:$0xff] }
 0x31c   : > { %1677 = vmatpush.msra.mxu2 %v1524_v51  ;;  %1697 = vmatpush.msra.mxu3 %v1588_v26  ;;  %v1576_v29 = vld [vmem:[#allocation2 + $0x660] sm:$0xff]  ;;  %v1453_v30 = vld [vmem:[#allocation2 + $0x288] sm:$0xff] }
 0x31d   : > { %1709 = vmatpush.msrb.mxu0 %v1429_v22  ;;  %1729 = vmatpush.msrb.mxu1 %v1493_v56  ;;  %v1508_v53 = vld [vmem:[#allocation2 + $0x440] sm:$0xff]  ;;  %v1541_v58 = vld [vmem:[#allocation2 + $0x548] sm:$0xff] }
 0x31e   : > { %1678 = vmatpush.msra.mxu2 %v1520_v37  ;;  %1698 = vmatpush.msra.mxu3 %v1584_v14  ;;  %v1572_v49 = vld [vmem:[#allocation2 + $0x640] sm:$0xff]  ;;  %v1605_v32 = vld [vmem:[#allocation2 + $0x748] sm:$0xff] }
 0x31f   : > { %1710 = vmatpush.msrb.mxu0 %v1425_v63  ;;  %1730 = vmatpush.msrb.mxu1 %v1489_v16  ;;  %v1504_v12 = vld [vmem:[#allocation2 + $0x420] sm:$0xff]  ;;  %v1385_v36 = vld [vmem:[#allocation2 + $0x68] sm:$0xff] }
 0x320   : > { %1679 = vmatpush.msra.mxu2 %v1516_v6  ;;  %1699 = vmatpush.msra.mxu3 %v1580_v19  ;;  %v1568_v28 = vld [vmem:[#allocation2 + $0x620] sm:$0xff]  ;;  %v1449_v18 = vld [vmem:[#allocation2 + $0x268] sm:$0xff] }
 0x321   : > { %1711 = vmatpush.msrb.mxu0 %v1421_v54  ;;  %1731 = vmatpush.msrb.mxu1 %v1485_v43  ;;  %v1500_v0 = vld [vmem:[#allocation2 + $0x400] sm:$0xff]  ;;  %v1537_v50 = vld [vmem:[#allocation2 + $0x528] sm:$0xff] }
 0x322   : > { %1680 = vmatpush.msra.mxu2 %v1512_v8  ;;  %1700 = vmatpush.msra.mxu3 %v1576_v29  ;;  %v1564_v4 = vld [vmem:[#allocation2 + $0x600] sm:$0xff]  ;;  %v1601_v48 = vld [vmem:[#allocation2 + $0x728] sm:$0xff] }
 0x323   : > { %1712 = vmatpush.msrb.mxu0 %v1417_v5  ;;  %1732 = vmatpush.msrb.mxu1 %v1481_v42  ;;  %v1381_v21 = vld [vmem:[#allocation2 + $0x48] sm:$0xff] }
 0x324   : > { %1681 = vmatpush.msra.mxu2 %v1508_v53  ;;  %1701 = vmatpush.msra.mxu3 %v1572_v49  ;;  %v1445_v20 = vld [vmem:[#allocation2 + $0x248] sm:$0xff]  ;;  %v1434_v49 = vld [vmem:[#allocation2 + $0x1f0] sm:$0xff] }
 0x325   : > { %1713 = vmatpush.msrb.mxu0 %v1413_v60  ;;  %1733 = vmatpush.msrb.mxu1 %v1477_v55  ;;  %v1533_v57 = vld [vmem:[#allocation2 + $0x508] sm:$0xff]  ;;  %v1498_v60 = vld [vmem:[#allocation2 + $0x3f0] sm:$0xff] }
 0x326   : > { %1682 = vmatpush.msra.mxu2 %v1504_v12  ;;  %1702 = vmatpush.msra.mxu3 %v1568_v28  ;;  %v1597_v41 = vld [vmem:[#allocation2 + $0x708] sm:$0xff]  ;;  %v1430_v55 = vld [vmem:[#allocation2 + $0x1d0] sm:$0xff] }
 0x327   : > { %1714 = vmatpush.msrb.mxu0 %v1409_v24  ;;  %1734 = vmatpush.msrb.mxu1 %v1473_v25  ;;  %v1377_v62 = vld [vmem:[#allocation2 + $0x28] sm:$0xff]  ;;  %v1494_v12 = vld [vmem:[#allocation2 + $0x3d0] sm:$0xff] }
 0x328   : > { %1683 = vmatpush.msra.mxu2 %v1500_v0  ;;  %1703 = vmatpush.msra.mxu3 %v1564_v4  ;;  %v1441_v9 = vld [vmem:[#allocation2 + $0x228] sm:$0xff]  ;;  %v1426_v28 = vld [vmem:[#allocation2 + $0x1b0] sm:$0xff] }
 0x329   : > { %1715 = vmatpush.msrb.mxu0 %v1405_v38  ;;  %1735 = vmatpush.msrb.mxu1 %v1469_v27  ;;  %v1529_v11 = vld [vmem:[#allocation2 + $0x4e8] sm:$0xff]  ;;  %v1490_v24 = vld [vmem:[#allocation2 + $0x3b0] sm:$0xff] }
 0x32a   : > { %1748 = vmatpush.msrb.mxu2 %v1561_v10  ;;  %1768 = vmatpush.msrb.mxu3 %v1625_v17  ;;  %v1593_v3 = vld [vmem:[#allocation2 + $0x6e8] sm:$0xff]  ;;  %v1422_v25 = vld [vmem:[#allocation2 + $0x190] sm:$0xff] }
 0x32b   : > { %1716 = vmatpush.msrb.mxu0 %v1401_v31  ;;  %1736 = vmatpush.msrb.mxu1 %v1465_v35  ;;  %v1373_v13 = vld [vmem:[#allocation2 + $0x8] sm:$0xff]  ;;  %v1486_v0 = vld [vmem:[#allocation2 + $0x390] sm:$0xff] }
 0x32c   : > { %1749 = vmatpush.msrb.mxu2 %v1557_v44  ;;  %1769 = vmatpush.msrb.mxu3 %v1621_v1  ;;  %v1437_v61 = vld [vmem:[#allocation2 + $0x208] sm:$0xff]  ;;  %v1418_v4 = vld [vmem:[#allocation2 + $0x170] sm:$0xff] }
 0x32d   : > { %1717 = vmatpush.msrb.mxu0 %v1397_v47  ;;  %1737 = vmatpush.msrb.mxu1 %v1461_v52  ;;  %v1525_v7 = vld [vmem:[#allocation2 + $0x4c8] sm:$0xff]  ;;  %v1482_v10 = vld [vmem:[#allocation2 + $0x370] sm:$0xff] }
 0x32e   : > { %1750 = vmatpush.msrb.mxu2 %v1553_v15  ;;  %1770 = vmatpush.msrb.mxu3 %v1617_v46  ;;  %v1589_v39 = vld [vmem:[#allocation2 + $0x6c8] sm:$0xff]  ;;  %v1414_v17 = vld [vmem:[#allocation2 + $0x150] sm:$0xff] }
 0x32f   : > { %1718 = vmatpush.msrb.mxu0 %v1393_v40  ;;  %1738 = vmatpush.msrb.mxu1 %v1457_v45  ;;  %v1521_v51 = vld [vmem:[#allocation2 + $0x4a8] sm:$0xff]  ;;  %v1478_v38 = vld [vmem:[#allocation2 + $0x350] sm:$0xff] }
 0x330   : > { %1751 = vmatpush.msrb.mxu2 %v1549_v34  ;;  %1771 = vmatpush.msrb.mxu3 %v1613_v2  ;;  %v1585_v26 = vld [vmem:[#allocation2 + $0x6a8] sm:$0xff]  ;;  %v1410_v27 = vld [vmem:[#allocation2 + $0x130] sm:$0xff] }
 0x331   : > { %1719 = vmatpush.msrb.mxu0 %v1389_v33  ;;  %1739 = vmatpush.msrb.mxu1 %v1453_v30  ;;  %v1517_v22 = vld [vmem:[#allocation2 + $0x488] sm:$0xff]  ;;  %v1474_v44 = vld [vmem:[#allocation2 + $0x330] sm:$0xff] }
 0x332   : > { %1752 = vmatpush.msrb.mxu2 %v1545_v23  ;;  %1772 = vmatpush.msrb.mxu3 %v1609_v59  ;;  %v1581_v56 = vld [vmem:[#allocation2 + $0x688] sm:$0xff]  ;;  %v1406_v1 = vld [vmem:[#allocation2 + $0x110] sm:$0xff] }
 0x333   : > { %1720 = vmatpush.msrb.mxu0 %v1385_v36  ;;  %1740 = vmatpush.msrb.mxu1 %v1449_v18  ;;  %v1513_v37 = vld [vmem:[#allocation2 + $0x468] sm:$0xff]  ;;  %v1470_v31 = vld [vmem:[#allocation2 + $0x310] sm:$0xff] }
 0x334   : > { %1753 = vmatpush.msrb.mxu2 %v1541_v58  ;;  %1773 = vmatpush.msrb.mxu3 %v1605_v32  ;;  %v1577_v14 = vld [vmem:[#allocation2 + $0x668] sm:$0xff]  ;;  %v1402_v35 = vld [vmem:[#allocation2 + $0xf0] sm:$0xff] }
 0x335   : > { %1721 = vmatpush.msrb.mxu0 %v1381_v21  ;;  %1741 = vmatpush.msrb.mxu1 %v1445_v20  ;;  %v1509_v63 = vld [vmem:[#allocation2 + $0x448] sm:$0xff]  ;;  %v1466_v15 = vld [vmem:[#allocation2 + $0x2f0] sm:$0xff] }
 0x336   : > { %1754 = vmatpush.msrb.mxu2 %v1537_v50  ;;  %1774 = vmatpush.msrb.mxu3 %v1601_v48  ;;  %v1573_v16 = vld [vmem:[#allocation2 + $0x648] sm:$0xff]  ;;  %v1398_v46 = vld [vmem:[#allocation2 + $0xd0] sm:$0xff] }
 0x337   : > { %1722 = vmatpush.msrb.mxu0 %v1377_v62  ;;  %1742 = vmatpush.msrb.mxu1 %v1441_v9  ;;  %v1505_v6 = vld [vmem:[#allocation2 + $0x428] sm:$0xff]  ;;  %v1462_v47 = vld [vmem:[#allocation2 + $0x2d0] sm:$0xff] }
 0x338   : > { %1755 = vmatpush.msrb.mxu2 %v1533_v57  ;;  %1775 = vmatpush.msrb.mxu3 %v1597_v41  ;;  %v1569_v19 = vld [vmem:[#allocation2 + $0x628] sm:$0xff]  ;;  %v1394_v52 = vld [vmem:[#allocation2 + $0xb0] sm:$0xff] }
 0x339   : > { %1723 = vmatpush.msrb.mxu0 %v1373_v13  ;;  %1743 = vmatpush.msrb.mxu1 %v1437_v61  ;;  %v1501_v54 = vld [vmem:[#allocation2 + $0x408] sm:$0xff]  ;;  %v1458_v34 = vld [vmem:[#allocation2 + $0x2b0] sm:$0xff] }
 0x33a   : > { %1756 = vmatpush.msrb.mxu2 %v1529_v11  ;;  %1776 = vmatpush.msrb.mxu3 %v1593_v3  ;;  %v1565_v43 = vld [vmem:[#allocation2 + $0x608] sm:$0xff]  ;;  %v1390_v2 = vld [vmem:[#allocation2 + $0x90] sm:$0xff] }
 0x33b   : > { %v1454_v40 = vld [vmem:[#allocation2 + $0x290] sm:$0xff] }
 0x33c   : > { %1757 = vmatpush.msrb.mxu2 %v1525_v7  ;;  %1777 = vmatpush.msrb.mxu3 %v1589_v39  ;;  %v1562_v30 = vld [vmem:[#allocation2 + $0x5f0] sm:$0xff]  ;;  %v1435_v39 = vld [vmem:[#allocation2 + $0x1f8] sm:$0xff] }
 0x33d   : > { %v1626_v58 = vld [vmem:[#allocation2 + $0x7f0] sm:$0xff] }
 0x33e   : > { %1758 = vmatpush.msrb.mxu2 %v1521_v51  ;;  %1778 = vmatpush.msrb.mxu3 %v1585_v26  ;;  %v1386_v32 = vld [vmem:[#allocation2 + $0x70] sm:$0xff]  ;;  %v1499_v51 = vld [vmem:[#allocation2 + $0x3f8] sm:$0xff] }
 0x33f   : > { %v1450_v36 = vld [vmem:[#allocation2 + $0x270] sm:$0xff] }
 0x340   : > { %1759 = vmatpush.msrb.mxu2 %v1517_v22  ;;  %1779 = vmatpush.msrb.mxu3 %v1581_v56  ;;  %v1558_v18 = vld [vmem:[#allocation2 + $0x5d0] sm:$0xff]  ;;  %v1431_v56 = vld [vmem:[#allocation2 + $0x1d8] sm:$0xff] }
 0x341   : > { %v1622_v50 = vld [vmem:[#allocation2 + $0x7d0] sm:$0xff] }
 0x342   : > { %1760 = vmatpush.msrb.mxu2 %v1513_v37  ;;  %1780 = vmatpush.msrb.mxu3 %v1577_v14  ;;  %v1382_v48 = vld [vmem:[#allocation2 + $0x50] sm:$0xff]  ;;  %v1495_v37 = vld [vmem:[#allocation2 + $0x3d8] sm:$0xff] }
 0x343   : > { %v1446_v21 = vld [vmem:[#allocation2 + $0x250] sm:$0xff] }
 0x344   : > { %1761 = vmatpush.msrb.mxu2 %v1509_v63  ;;  %1781 = vmatpush.msrb.mxu3 %v1573_v16  ;;  %v1554_v20 = vld [vmem:[#allocation2 + $0x5b0] sm:$0xff]  ;;  %v1427_v16 = vld [vmem:[#allocation2 + $0x1b8] sm:$0xff] }
 0x345   : > { %v1618_v57 = vld [vmem:[#allocation2 + $0x7b0] sm:$0xff] }
 0x346   : > { %1762 = vmatpush.msrb.mxu2 %v1505_v6  ;;  %1782 = vmatpush.msrb.mxu3 %v1569_v19  ;;  %v1287_v8 = vpop.permute.xlu1 %1286  ;;  %v1378_v41 = vld [vmem:[#allocation2 + $0x30] sm:$0xff]  ;;  %v1491_v6 = vld [vmem:[#allocation2 + $0x3b8] sm:$0xff] }
 0x347   : > { %v1442_v62 = vld [vmem:[#allocation2 + $0x230] sm:$0xff] }
 0x348   : > { %1763 = vmatpush.msrb.mxu2 %v1501_v54  ;;  %1783 = vmatpush.msrb.mxu3 %v1565_v43  ;;  %v1550_v9 = vld [vmem:[#allocation2 + $0x590] sm:$0xff]  ;;  %v1423_v43 = vld [vmem:[#allocation2 + $0x198] sm:$0xff] }
 0x349   : > { %v1614_v11 = vld [vmem:[#allocation2 + $0x790] sm:$0xff] }
 0x34a   : > { %v1374_v3 = vld [vmem:[#allocation2 + $0x10] sm:$0xff] }
 0x34b   : > { %v1438_v13 = vld [vmem:[#allocation2 + $0x210] sm:$0xff] }
 0x34c   : > { %v1546_v61 = vld [vmem:[#allocation2 + $0x570] sm:$0xff] }
 0x34d   : > { %v1610_v7 = vld [vmem:[#allocation2 + $0x770] sm:$0xff] }
 0x34e   : > { %v1542_v26 = vld [vmem:[#allocation2 + $0x550] sm:$0xff] }
 0x34f   : > { %v1606_v22 = vld [vmem:[#allocation2 + $0x750] sm:$0xff] }
 0x350   : > { %v1538_v14 = vld [vmem:[#allocation2 + $0x530] sm:$0xff] }
 0x351   : > { %v1602_v63 = vld [vmem:[#allocation2 + $0x730] sm:$0xff] }
 0x352   : > { %v1534_v19 = vld [vmem:[#allocation2 + $0x510] sm:$0xff] }
 0x353   : > { %v1598_v54 = vld [vmem:[#allocation2 + $0x710] sm:$0xff] }
 0x374   : > { %v1309_v29 = vpop.f32.mrf.mxu0  ;;  %v1329_v5 = vpop.f32.mrf.mxu1 }
 0x375   : > { %v3225_v42 = vadd.f32 %v1309_v29, %v1287_v8  ;;  %v3227_v53 = vadd.f32 %v1329_v5, %v1287_v8  ;;  %v1530_v29 = vld [vmem:[#allocation2 + $0x4f0] sm:$0xff] }
 0x376   : > { %v1594_v5 = vld [vmem:[#allocation2 + $0x6f0] sm:$0xff] }
 0x377   : > { %1644 = vmatmul.f32.vlgmr.msra.gmra.mxu0 %v3225_v42  ;;  %1664 = vmatmul.f32.vlgmr.msra.gmra.mxu1 %v3227_v53 }
 0x378   : > { %1788 = vmatpush.msra.mxu0 %v1434_v49  ;;  %1808 = vmatpush.msra.mxu1 %v1498_v60  ;;  %v1419_v49 = vld [vmem:[#allocation2 + $0x178] sm:$0xff] }
 0x379   : > { %v1483_v60 = vld [vmem:[#allocation2 + $0x378] sm:$0xff] }
 0x37a   : > { %1789 = vmatpush.msra.mxu0 %v1430_v55  ;;  %1809 = vmatpush.msra.mxu1 %v1494_v12  ;;  %v1526_v55 = vld [vmem:[#allocation2 + $0x4d0] sm:$0xff] }
 0x37b   : > { %v1590_v12 = vld [vmem:[#allocation2 + $0x6d0] sm:$0xff] }
 0x37c   : > { %1790 = vmatpush.msra.mxu0 %v1426_v28  ;;  %1810 = vmatpush.msra.mxu1 %v1490_v24  ;;  %v1415_v28 = vld [vmem:[#allocation2 + $0x158] sm:$0xff] }
 0x37d   : > { %v1479_v24 = vld [vmem:[#allocation2 + $0x358] sm:$0xff] }
 0x37e   : > { %1791 = vmatpush.msra.mxu0 %v1422_v25  ;;  %1811 = vmatpush.msra.mxu1 %v1486_v0  ;;  %v1522_v25 = vld [vmem:[#allocation2 + $0x4b0] sm:$0xff] }
 0x37f   : > { %1724 = vmatmul.f32.vlgmr.msrb.gmra.mxu0 %v3225_v42  ;;  %1744 = vmatmul.f32.vlgmr.msrb.gmra.mxu1 %v3227_v53  ;;  %v1586_v0 = vld [vmem:[#allocation2 + $0x6b0] sm:$0xff] }
 0x380   : > { %1792 = vmatpush.msra.mxu0 %v1418_v4  ;;  %1812 = vmatpush.msra.mxu1 %v1482_v10  ;;  %v1518_v4 = vld [vmem:[#allocation2 + $0x490] sm:$0xff] }
 0x381   : > { %v1582_v10 = vld [vmem:[#allocation2 + $0x690] sm:$0xff] }
 0x382   : > { %1793 = vmatpush.msra.mxu0 %v1414_v17  ;;  %1813 = vmatpush.msra.mxu1 %v1478_v38  ;;  %v1411_v17 = vld [vmem:[#allocation2 + $0x138] sm:$0xff] }
 0x383   : > { %v1475_v38 = vld [vmem:[#allocation2 + $0x338] sm:$0xff] }
 0x384   : > { %1794 = vmatpush.msra.mxu0 %v1410_v27  ;;  %1814 = vmatpush.msra.mxu1 %v1474_v44  ;;  %v1514_v27 = vld [vmem:[#allocation2 + $0x470] sm:$0xff] }
 0x385   : > { %v1578_v44 = vld [vmem:[#allocation2 + $0x670] sm:$0xff] }
 0x386   : > { %1795 = vmatpush.msra.mxu0 %v1406_v1  ;;  %1815 = vmatpush.msra.mxu1 %v1470_v31  ;;  %v1407_v1 = vld [vmem:[#allocation2 + $0x118] sm:$0xff] }
 0x387   : > { %v1471_v31 = vld [vmem:[#allocation2 + $0x318] sm:$0xff] }
 0x388   : > { %1796 = vmatpush.msra.mxu0 %v1402_v35  ;;  %1816 = vmatpush.msra.mxu1 %v1466_v15  ;;  %v1510_v35 = vld [vmem:[#allocation2 + $0x450] sm:$0xff] }
 0x389   : > { %v1574_v15 = vld [vmem:[#allocation2 + $0x650] sm:$0xff] }
 0x38a   : > { %1797 = vmatpush.msra.mxu0 %v1398_v46  ;;  %1817 = vmatpush.msra.mxu1 %v1462_v47  ;;  %v1403_v46 = vld [vmem:[#allocation2 + $0xf8] sm:$0xff] }
 0x38b   : > { %v1467_v47 = vld [vmem:[#allocation2 + $0x2f8] sm:$0xff] }
 0x38c   : > { %v1349_v45 = vpop.f32.mrf.mxu2  ;;  %v1369_v23 = vpop.f32.mrf.mxu3  ;;  %1798 = vmatpush.msra.mxu0 %v1394_v52  ;;  %1818 = vmatpush.msra.mxu1 %v1458_v34  ;;  %v1506_v52 = vld [vmem:[#allocation2 + $0x430] sm:$0xff] }
 0x38d   : > { %v3233_v59 = vadd.f32 %v1349_v45, %v1287_v8  ;;  %v3235_v33 = vadd.f32 %v1369_v23, %v1287_v8  ;;  %v1487_v8 = vld [vmem:[#allocation2 + $0x398] sm:$0xff]  ;;  %v1570_v34 = vld [vmem:[#allocation2 + $0x630] sm:$0xff] }
 0x38e   : > { %1799 = vmatpush.msra.mxu0 %v1390_v2  ;;  %1819 = vmatpush.msra.mxu1 %v1454_v40  ;;  %v1399_v2 = vld [vmem:[#allocation2 + $0xd8] sm:$0xff]  ;;  %v1502_v45 = vld [vmem:[#allocation2 + $0x410] sm:$0xff] }
 0x38f   : > { %1684 = vmatmul.f32.vlgmr.msra.gmra.mxu2 %v3233_v59  ;;  %1704 = vmatmul.f32.vlgmr.msra.gmra.mxu3 %v3235_v33  ;;  %v1463_v40 = vld [vmem:[#allocation2 + $0x2d8] sm:$0xff]  ;;  %v1566_v23 = vld [vmem:[#allocation2 + $0x610] sm:$0xff] }
 0x390   : > { %1828 = vmatpush.msra.mxu2 %v1562_v30  ;;  %1848 = vmatpush.msra.mxu3 %v1626_v58  ;;  %v1563_v30 = vld [vmem:[#allocation2 + $0x5f8] sm:$0xff] }
 0x391   : > { %1800 = vmatpush.msra.mxu0 %v1386_v32  ;;  %1820 = vmatpush.msra.mxu1 %v1450_v36  ;;  %v1627_v58 = vld [vmem:[#allocation2 + $0x7f8] sm:$0xff] }
 0x392   : > { %1829 = vmatpush.msra.mxu2 %v1558_v18  ;;  %1849 = vmatpush.msra.mxu3 %v1622_v50  ;;  %v1395_v32 = vld [vmem:[#allocation2 + $0xb8] sm:$0xff] }
 0x393   : > { %1801 = vmatpush.msra.mxu0 %v1382_v48  ;;  %1821 = vmatpush.msra.mxu1 %v1446_v21  ;;  %v1459_v36 = vld [vmem:[#allocation2 + $0x2b8] sm:$0xff] }
 0x394   : > { %1830 = vmatpush.msra.mxu2 %v1554_v20  ;;  %1850 = vmatpush.msra.mxu3 %v1618_v57  ;;  %v1559_v18 = vld [vmem:[#allocation2 + $0x5d8] sm:$0xff] }
 0x395   : > { %1802 = vmatpush.msra.mxu0 %v1378_v41  ;;  %1822 = vmatpush.msra.mxu1 %v1442_v62  ;;  %v1623_v50 = vld [vmem:[#allocation2 + $0x7d8] sm:$0xff] }
 0x396   : > { %1831 = vmatpush.msra.mxu2 %v1550_v9  ;;  %1851 = vmatpush.msra.mxu3 %v1614_v11  ;;  %v1391_v48 = vld [vmem:[#allocation2 + $0x98] sm:$0xff] }
 0x397   : > { %1803 = vmatpush.msra.mxu0 %v1374_v3  ;;  %1823 = vmatpush.msra.mxu1 %v1438_v13  ;;  %v1455_v21 = vld [vmem:[#allocation2 + $0x298] sm:$0xff] }
 0x398   : > { %1832 = vmatpush.msra.mxu2 %v1546_v61  ;;  %1852 = vmatpush.msra.mxu3 %v1610_v7  ;;  %v1555_v20 = vld [vmem:[#allocation2 + $0x5b8] sm:$0xff] }
 0x399   : > { %1868 = vmatpush.msrb.mxu0 %v1435_v39  ;;  %1888 = vmatpush.msrb.mxu1 %v1499_v51  ;;  %v1619_v57 = vld [vmem:[#allocation2 + $0x7b8] sm:$0xff] }
 0x39a   : > { %1833 = vmatpush.msra.mxu2 %v1542_v26  ;;  %1853 = vmatpush.msra.mxu3 %v1606_v22  ;;  %v1551_v41 = vld [vmem:[#allocation2 + $0x598] sm:$0xff] }
 0x39b   : > { %1869 = vmatpush.msrb.mxu0 %v1431_v56  ;;  %1889 = vmatpush.msrb.mxu1 %v1495_v37  ;;  %v1615_v62 = vld [vmem:[#allocation2 + $0x798] sm:$0xff] }
 0x39c   : > { %1834 = vmatpush.msra.mxu2 %v1538_v14  ;;  %1854 = vmatpush.msra.mxu3 %v1602_v63  ;;  %v1387_v9 = vld [vmem:[#allocation2 + $0x78] sm:$0xff] }
 0x39d   : > { %1870 = vmatpush.msrb.mxu0 %v1427_v16  ;;  %1890 = vmatpush.msrb.mxu1 %v1491_v6  ;;  %v1451_v11 = vld [vmem:[#allocation2 + $0x278] sm:$0xff] }
 0x39e   : > { %1835 = vmatpush.msra.mxu2 %v1534_v19  ;;  %1855 = vmatpush.msra.mxu3 %v1598_v54  ;;  %v1547_v3 = vld [vmem:[#allocation2 + $0x578] sm:$0xff] }
 0x39f   : > { %1871 = vmatpush.msrb.mxu0 %v1423_v43  ;;  %1891 = vmatpush.msrb.mxu1 %v1487_v8  ;;  %v1611_v13 = vld [vmem:[#allocation2 + $0x778] sm:$0xff] }
 0x3a0   : > { %1836 = vmatpush.msra.mxu2 %v1530_v29  ;;  %1856 = vmatpush.msra.mxu3 %v1594_v5  ;;  %v1383_v61 = vld [vmem:[#allocation2 + $0x58] sm:$0xff] }
 0x3a1   : > { %1872 = vmatpush.msrb.mxu0 %v1419_v49  ;;  %1892 = vmatpush.msrb.mxu1 %v1483_v60  ;;  %v1447_v7 = vld [vmem:[#allocation2 + $0x258] sm:$0xff] }
 0x3a2   : > { %1837 = vmatpush.msra.mxu2 %v1526_v55  ;;  %1857 = vmatpush.msra.mxu3 %v1590_v12  ;;  %v1543_v39 = vld [vmem:[#allocation2 + $0x558] sm:$0xff] }
 0x3a3   : > { %1873 = vmatpush.msrb.mxu0 %v1415_v28  ;;  %1893 = vmatpush.msrb.mxu1 %v1479_v24  ;;  %v1607_v51 = vld [vmem:[#allocation2 + $0x758] sm:$0xff] }
 0x3a4   : > { %1838 = vmatpush.msra.mxu2 %v1522_v25  ;;  %1858 = vmatpush.msra.mxu3 %v1586_v0  ;;  %v1379_v26 = vld [vmem:[#allocation2 + $0x38] sm:$0xff] }
 0x3a5   : > { %1764 = vmatmul.f32.vlgmr.msrb.gmra.mxu2 %v3233_v59  ;;  %1784 = vmatmul.f32.vlgmr.msrb.gmra.mxu3 %v3235_v33  ;;  %v1539_v22 = vld [vmem:[#allocation2 + $0x538] sm:$0xff] }
 0x3a6   : > { %1839 = vmatpush.msra.mxu2 %v1518_v4  ;;  %1859 = vmatpush.msra.mxu3 %v1582_v10  ;;  %v1603_v56 = vld [vmem:[#allocation2 + $0x738] sm:$0xff] }
 0x3a7   : > { %1874 = vmatpush.msrb.mxu0 %v1411_v17  ;;  %1894 = vmatpush.msrb.mxu1 %v1475_v38  ;;  %v1443_v37 = vld [vmem:[#allocation2 + $0x238] sm:$0xff] }
 0x3a8   : > { %1840 = vmatpush.msra.mxu2 %v1514_v27  ;;  %1860 = vmatpush.msra.mxu3 %v1578_v44  ;;  %v1535_v14 = vld [vmem:[#allocation2 + $0x518] sm:$0xff] }
 0x3a9   : > { %1875 = vmatpush.msrb.mxu0 %v1407_v1  ;;  %1895 = vmatpush.msrb.mxu1 %v1471_v31  ;;  %v1599_v63 = vld [vmem:[#allocation2 + $0x718] sm:$0xff] }
 0x3aa   : > { %1841 = vmatpush.msra.mxu2 %v1510_v35  ;;  %1861 = vmatpush.msra.mxu3 %v1574_v15  ;;  %v1375_v16 = vld [vmem:[#allocation2 + $0x18] sm:$0xff] }
 0x3ab   : > { %1876 = vmatpush.msrb.mxu0 %v1403_v46  ;;  %1896 = vmatpush.msrb.mxu1 %v1467_v47  ;;  %v1439_v6 = vld [vmem:[#allocation2 + $0x218] sm:$0xff] }
 0x3ac   : > { %1842 = vmatpush.msra.mxu2 %v1506_v52  ;;  %1862 = vmatpush.msra.mxu3 %v1570_v34  ;;  %v1531_v19 = vld [vmem:[#allocation2 + $0x4f8] sm:$0xff] }
 0x3ad   : > { %1877 = vmatpush.msrb.mxu0 %v1399_v2  ;;  %1897 = vmatpush.msrb.mxu1 %v1463_v40  ;;  %v1595_v54 = vld [vmem:[#allocation2 + $0x6f8] sm:$0xff] }
 0x3ae   : > { %1843 = vmatpush.msra.mxu2 %v1502_v45  ;;  %1863 = vmatpush.msra.mxu3 %v1566_v23  ;;  %v1527_v43 = vld [vmem:[#allocation2 + $0x4d8] sm:$0xff] }
 0x3af   : > { %1878 = vmatpush.msrb.mxu0 %v1395_v32  ;;  %1898 = vmatpush.msrb.mxu1 %v1459_v36  ;;  %v1591_v8 = vld [vmem:[#allocation2 + $0x6d8] sm:$0xff] }
 0x3b0   : > { %1908 = vmatpush.msrb.mxu2 %v1563_v30  ;;  %1928 = vmatpush.msrb.mxu3 %v1627_v58  ;;  %v1523_v29 = vld [vmem:[#allocation2 + $0x4b8] sm:$0xff] }
 0x3b1   : > { %1879 = vmatpush.msrb.mxu0 %v1391_v48  ;;  %1899 = vmatpush.msrb.mxu1 %v1455_v21  ;;  %v1587_v5 = vld [vmem:[#allocation2 + $0x6b8] sm:$0xff]  ;;  %v1962_v48 = vlaneseq }
 0x3b2   : > { %1909 = vmatpush.msrb.mxu2 %v1559_v18  ;;  %1929 = vmatpush.msrb.mxu3 %v1623_v50  ;;  %v1519_v49 = vld [vmem:[#allocation2 + $0x498] sm:$0xff] }
 0x3b3   : > { %1804 = vmatmul.f32.vlgmr.msra.gmra.mxu0 %v3225_v42  ;;  %1824 = vmatmul.f32.vlgmr.msra.gmra.mxu1 %v3227_v53  ;;  %v1583_v60 = vld [vmem:[#allocation2 + $0x698] sm:$0xff]  ;;  %vm1964_vm5 = vcmp.lt.s32.totalorder %v1962_v48, 512 }
 0x3b4   : > { %1910 = vmatpush.msrb.mxu2 %v1555_v20  ;;  %1930 = vmatpush.msrb.mxu3 %v1619_v57  ;;  %v1515_v55 = vld [vmem:[#allocation2 + $0x478] sm:$0xff] }
 0x3b5   : > { %1880 = vmatpush.msrb.mxu0 %v1387_v9  ;;  %1900 = vmatpush.msrb.mxu1 %v1451_v11  ;;  %v1579_v12 = vld [vmem:[#allocation2 + $0x678] sm:$0xff] }
 0x3b6   : > { %1911 = vmatpush.msrb.mxu2 %v1551_v41  ;;  %1931 = vmatpush.msrb.mxu3 %v1615_v62  ;;  %v1511_v28 = vld [vmem:[#allocation2 + $0x458] sm:$0xff] }
 0x3b7   : > { %1881 = vmatpush.msrb.mxu0 %v1383_v61  ;;  %1901 = vmatpush.msrb.mxu1 %v1447_v7  ;;  %v1575_v24 = vld [vmem:[#allocation2 + $0x658] sm:$0xff] }
 0x3b8   : > { %1912 = vmatpush.msrb.mxu2 %v1547_v3  ;;  %1932 = vmatpush.msrb.mxu3 %v1611_v13  ;;  %v1507_v25 = vld [vmem:[#allocation2 + $0x438] sm:$0xff] }
 0x3b9   : > { %1844 = vmatmul.f32.vlgmr.msra.gmra.mxu2 %v3233_v59  ;;  %1882 = vmatpush.msrb.mxu0 %v1379_v26  ;;  %v1567_v0 = vld [vmem:[#allocation2 + $0x618] sm:$0xff] }
 0x3ba   : > { %1913 = vmatpush.msrb.mxu2 %v1543_v39  ;;  %1933 = vmatpush.msrb.mxu3 %v1607_v51 }
 0x3bb   : > { %1902 = vmatpush.msrb.mxu1 %v1443_v37  ;;  %1864 = vmatmul.f32.vlgmr.msra.gmra.mxu3 %v3235_v33 }
 0x3bc   : > { %1914 = vmatpush.msrb.mxu2 %v1539_v22  ;;  %1934 = vmatpush.msrb.mxu3 %v1603_v56 }
 0x3bd   : > { %1883 = vmatpush.msrb.mxu0 %v1375_v16  ;;  %1903 = vmatpush.msrb.mxu1 %v1439_v6 }
 0x3be   : > { %1915 = vmatpush.msrb.mxu2 %v1535_v14  ;;  %1935 = vmatpush.msrb.mxu3 %v1599_v63 }
 0x3bf   : > { %1884 = vmatmul.f32.vlgmr.msrb.gmra.mxu0 %v3225_v42  ;;  %1904 = vmatmul.f32.vlgmr.msrb.gmra.mxu1 %v3227_v53  ;;  %v1571_v42 = vld [vmem:[#allocation2 + $0x638] sm:$0xff] }
 0x3c0   : > { %1916 = vmatpush.msrb.mxu2 %v1531_v19  ;;  %1936 = vmatpush.msrb.mxu3 %v1595_v54  ;;  %v1503_v53 = vld [vmem:[#allocation2 + $0x418] sm:$0xff] }
 0x3c2   : > { %1917 = vmatpush.msrb.mxu2 %v1527_v43  ;;  %1937 = vmatpush.msrb.mxu3 %v1591_v8 }
 0x3c4   : > { %1918 = vmatpush.msrb.mxu2 %v1523_v29  ;;  %1938 = vmatpush.msrb.mxu3 %v1587_v5 }
 0x3c6   : > { %1919 = vmatpush.msrb.mxu2 %v1519_v49  ;;  %1939 = vmatpush.msrb.mxu3 %v1583_v60 }
 0x3c8   : > { %1920 = vmatpush.msrb.mxu2 %v1515_v55  ;;  %1940 = vmatpush.msrb.mxu3 %v1579_v12 }
 0x3ca   : > { %1921 = vmatpush.msrb.mxu2 %v1511_v28  ;;  %1941 = vmatpush.msrb.mxu3 %v1575_v24 }
 0x3cc   : > { %1922 = vmatpush.msrb.mxu2 %v1507_v25  ;;  %1942 = vmatpush.msrb.mxu3 %v1571_v42 }
 0x3ce   : > { %1923 = vmatpush.msrb.mxu2 %v1503_v53  ;;  %1943 = vmatpush.msrb.mxu3 %v1567_v0 }
 0x3cf   : > { %1924 = vmatmul.f32.vlgmr.msrb.gmra.mxu2 %v3233_v59  ;;  %1944 = vmatmul.f32.vlgmr.msrb.gmra.mxu3 %v3235_v33 }
 0x3f4   : > { %v1645_v4 = vpop.f32.mrf.mxu0  ;;  %v1665_v10 = vpop.f32.mrf.mxu1 }
 0x3f5   : > { %v1666_v45 = vadd.f32 %v1665_v10, %v1645_v4 }
 0x3fc   : > { %v1725_v27 = vpop.f32.mrf.mxu0  ;;  %v1745_v44 = vpop.f32.mrf.mxu1 }
 0x3fd   : > { %v1746_v47 = vadd.f32 %v1745_v44, %v1725_v27 }
 0x412   : > { %v1685_v17 = vpop.f32.mrf.mxu2  ;;  %v1705_v38 = vpop.f32.mrf.mxu3 }
 0x413   : > { %v1686_v32 = vadd.f32 %v1685_v17, %v1666_v45 }
 0x415   : > { %v1706_v57 = vadd.f32 %v1705_v38, %v1686_v32 }
 0x428   : > { %v1765_v1 = vpop.f32.mrf.mxu2  ;;  %v1785_v31 = vpop.f32.mrf.mxu3 }
 0x429   : > { %v1766_v59 = vadd.f32 %v1765_v1, %v1746_v47 }
 0x42b   : > { %v1786_v23 = vadd.f32 %v1785_v31, %v1766_v59 }
 0x42d   : > { %v1952_v21 = vrot.slane %v1786_v23, 7 }
 0x42f   : > { %v1956_v9 = vsel %vm1955_vm2, %v1706_v57, %v1952_v21 }
 0x430   : > { %v1805_v35 = vpop.f32.mrf.mxu0  ;;  %v1825_v15 = vpop.f32.mrf.mxu1 }
 0x431   : > { %v1826_v34 = vadd.f32 %v1825_v15, %v1805_v35 }
 0x43c   : > { %v1845_v46 = vpop.f32.mrf.mxu2  ;;  %v1885_v33 = vpop.f32.mrf.mxu0 }
 0x43d   : > { %v1905_v2 = vpop.f32.mrf.mxu1  ;;  %v1846_v40 = vadd.f32 %v1845_v46, %v1826_v34 }
 0x43e   : > { %v1865_v52 = vpop.f32.mrf.mxu3  ;;  %v1906_v30 = vadd.f32 %v1905_v2, %v1885_v33 }
 0x43f   : > { %v1866_v36 = vadd.f32 %v1865_v52, %v1846_v40 }
 0x441   : > { %v1953_v41 = vrot.slane %v1866_v36, 6 }
 0x452   : > { %v1925_v58 = vpop.f32.mrf.mxu2  ;;  %v1945_v50 = vpop.f32.mrf.mxu3 }
 0x453   : > { %v1926_v18 = vadd.f32 %v1925_v58, %v1906_v30 }
 0x455   : > { %v1946_v20 = vadd.f32 %v1945_v50, %v1926_v18 }
 0x457   : > { %v1954_v62 = vrot.slane %v1946_v20, 5 }
 0x459   : > { %v1958_v11 = vsel %vm1957_vm3, %v1953_v41, %v1954_v62 }
 0x45a   : > { %v1960_v3 = vsel %vm1959_vm4, %v1956_v9, %v1958_v11 }
 0x45b   : > { %1966 = vst.msk [vmem:[%s262_s12] sm:$0xf] %vm1964_vm5, %v1960_v3 }
 0x45c   : > { %2359 = shalt.err (!%p2356_p8)
}
 0x45d   : > { %2243 = dma.vmem_to_hbm [thread:$0]  (%p2479_p5), %s1981_s13, 64, %s1983_s14, %s1968_s16  }
 0x45e PF: > { %p2255_p9 = scmp.ge.s32.totalorder %s2398_s24, 2  ;;  %s1994_s29 = sand.u32 1, %s2386_s21  }
 0x45f   : > { %s1995_s25 = scalar_lea.sflag [#allocation4], %s1994_s29 }
 0x460   : > { %p2250_p10 = pnand %p2255_p9, %p2483_p6 }
 0x462   : > { %p2251_p11 = pneg %p2250_p10 }
 0x464   : > { %2381 = dma.done.wait (%p2251_p11), %s1995_s25, 64  }
 0x465   : > { %2383 = vsyncadd (%p2251_p11), %s1995_s25, 4294967232  ;;  %p17_p12 = scmp.ge.s32.totalorder %s2466_s27, 4   ;;  %s3323_s21 = smov %s2390_s22 }
 0x466   : > { %s3324_s22 = smov %s2394_s23  ;;  %s3325_s23 = smov %s2477_s30 }
 0x467   : > { %s3326_s24 = smov %s2466_s27  ;;  %19 = sbr.rel (!%p17_p12) target bundleno = 4 (0x4), region = 85 }
 0x46c   :  { %2001 = vsyncpa [#allocation3], 1 }
 0x46d   :  { %2003 = vsyncpa [#allocation3 + $0x1], 1 }
 0x46e   :  { %2004 = vsyncpa [#allocation4], 1 }
 0x46f   :  { %2006 = vsyncpa [#allocation4 + $0x1], 1 }

</bundles_post_ra>
